<compile_context>
chip_gen: v7x
topology: tpu7x:2x2x1
jax: 0.10.0
libtpu: 0.0.40
codegen_flags: <defaults>
</compile_context>

<pallas_src>
import math

import jax
import jax.numpy as jnp
from jax import lax
from jax.experimental import pallas as pl
from jax.experimental.pallas import tpu as pltpu

# Safe on v5e/v6e (128 MiB physical VMEM) and v7x (64 MiB physical).
_VMEM_LIMIT_BYTES = 48 * 1024 * 1024


# ---------------------------------------------------------------------------
# Tiling helpers
# ---------------------------------------------------------------------------

def _round_up(x, m):
    return ((x + m - 1) // m) * m


def _choose_tile(dim, target, align):
    """Return (tile, padded_dim).  Full dim if it fits under target (always legal),
    otherwise an aligned divisor, otherwise pad the dim up to a tile multiple."""
    if dim <= target:
        return dim, dim
    t = (target // align) * align
    while t >= align:
        if dim % t == 0:
            return t, dim
        t -= align
    t = (target // align) * align
    return t, _round_up(dim, t)


def _pick_divisor_tile(dim, target, align):
    """Largest aligned divisor of dim that is <= target (full dim if dim <= target)."""
    if dim <= target:
        return dim
    t = (target // align) * align
    while t >= align:
        if dim % t == 0:
            return t
        t -= align
    return dim  # TODO(synk): ragged sequence lengths fall back to a full-dim block.


# ---------------------------------------------------------------------------
# Tiled linear (matmul + bias) kernel
# ---------------------------------------------------------------------------

def _make_matmul_bias_kernel(compute_dtype):
    def kernel(x_ref, w_ref, b_ref, o_ref, acc_ref):
        @pl.when(pl.program_id(2) == 0)
        def _():
            acc_ref[...] = jnp.zeros_like(acc_ref)

        acc_ref[...] += jnp.dot(
            x_ref[...].astype(compute_dtype),
            w_ref[...].astype(compute_dtype),
            preferred_element_type=jnp.float32,
        )

        @pl.when(pl.program_id(2) == pl.num_programs(2) - 1)
        def _():
            o_ref[...] = (acc_ref[...] + b_ref[...]).astype(o_ref.dtype)

    return kernel


def linear(x, w_t, b2, *, tm=512, tn=1024, tk=512,
           compute_dtype=jnp.float32, out_dtype=jnp.float32):
    """y = x @ w_t + b2.   x: (N, Din), w_t: (Din, Dout) pre-transposed, b2: (1, Dout)."""
    N, Din = x.shape
    Dw, Dout = w_t.shape
    assert Dw == Din
    tm, Np = _choose_tile(N, tm, 8)
    tn, Doutp = _choose_tile(Dout, tn, 128)
    tk, Dinp = _choose_tile(Din, tk, 128)
    # Zero-padding (instead of a silent full-dim fallback) keeps blocks aligned and
    # bounded; padded rows/cols contribute 0 to the dot and are sliced off below.
    if (Np, Dinp) != (N, Din):
        x = jnp.pad(x, ((0, Np - N), (0, Dinp - Din)))
    if (Dinp, Doutp) != (Din, Dout):
        w_t = jnp.pad(w_t, ((0, Dinp - Din), (0, Doutp - Dout)))
    if Doutp != Dout:
        b2 = jnp.pad(b2, ((0, 0), (0, Doutp - Dout)))

    grid = (Np // tm, Doutp // tn, Dinp // tk)
    y = pl.pallas_call(
        _make_matmul_bias_kernel(compute_dtype),
        out_shape=jax.ShapeDtypeStruct((Np, Doutp), out_dtype),
        grid=grid,
        in_specs=[
            pl.BlockSpec((tm, tk), lambda i, j, k: (i, k)),
            pl.BlockSpec((tk, tn), lambda i, j, k: (k, j)),
            pl.BlockSpec((1, tn), lambda i, j, k: (0, j)),
        ],
        out_specs=pl.BlockSpec((tm, tn), lambda i, j, k: (i, j)),
        scratch_shapes=[pltpu.VMEM((tm, tn), jnp.float32)],
        compiler_params=pltpu.CompilerParams(
            dimension_semantics=("parallel", "parallel", "arbitrary"),
            vmem_limit_bytes=_VMEM_LIMIT_BYTES),
    )(x, w_t, b2)
    if (Np, Doutp) != (N, Dout):
        y = y[:N, :Dout]
    return y


# ---------------------------------------------------------------------------
# Attention kernel A: need_weights=True (full-S rows, probs accumulated in o block)
# ---------------------------------------------------------------------------

def _make_attn_weights_kernel(num_heads, head_dim, compute_dtype):
    inv_h = 1.0 / num_heads

    def kernel(q_ref, k_ref, v_ref, o_ref, pm_ref):
        # q_ref: (H, tq, Dh)   k_ref/v_ref: (H, S, Dh)
        # o_ref: (tq, E) head-major lanes   pm_ref: (tq, S) head-averaged probs
        for h in range(num_heads):
            qh = q_ref[h].astype(compute_dtype)
            kh = k_ref[h].astype(compute_dtype)
            vh = v_ref[h].astype(compute_dtype)
            # q @ k^T without materializing a transpose: contract the last dims.
            s = lax.dot_general(qh, kh, (((1,), (1,)), ((), ())),
                                preferred_element_type=jnp.float32)        # (tq, S)
            m = jnp.max(s, axis=-1, keepdims=True)
            e = jnp.exp(s - m)
            denom = jnp.sum(e, axis=-1, keepdims=True)
            r = pl.reciprocal(denom, approx=True)      # EUP slot (keeps VALU free)
            r = r * (2.0 - denom * r)                  # one Newton step -> ~f32 accuracy
            p = e * r
            av = lax.dot_general(p.astype(compute_dtype), vh,
                                 (((1,), (0,)), ((), ())),
                                 preferred_element_type=jnp.float32)       # (tq, Dh)
            # Direct per-head store into the resident output block (VMEM); a single HBM
            # writeback DMA still happens once per grid step.
            o_ref[:, h * head_dim:(h + 1) * head_dim] = av.astype(o_ref.dtype)
            # Accumulate probabilities straight into the resident output block
            # (no live (tq,S) jnp value held across the head unroll).
            if h == 0:
                pm_ref[...] = p
            else:
                pm_ref[...] += p
        pm_ref[...] = pm_ref[...] * inv_h

    return kernel


def attention_with_weights(q4, kv5, *, tq=256, compute_dtype=jnp.float32,
                           out_dtype=jnp.float32):
    """q4: (B, H, T, Dh); kv5: (2, B, H, S, Dh) with [0]=K, [1]=V.
    Returns attn (B, T, E) and head-averaged probs (B, T, S)."""
    B, H, T, Dh = q4.shape
    S = kv5.shape[3]
    E = H * Dh
    tq = _pick_divisor_tile(T, tq, 8)
    grid = (B, T // tq)
    return pl.pallas_call(
        _make_attn_weights_kernel(H, Dh, compute_dtype),
        out_shape=(
            jax.ShapeDtypeStruct((B, T, E), out_dtype),
            jax.ShapeDtypeStruct((B, T, S), jnp.float32),
        ),
        grid=grid,
        in_specs=[
            pl.BlockSpec((None, H, tq, Dh), lambda b, qi: (b, 0, qi, 0)),
            pl.BlockSpec((None, None, H, S, Dh), lambda b, qi: (0, b, 0, 0, 0)),   # K
            pl.BlockSpec((None, None, H, S, Dh), lambda b, qi: (1, b, 0, 0, 0)),   # V
        ],
        out_specs=(
            pl.BlockSpec((None, tq, E), lambda b, qi: (b, qi, 0)),
            pl.BlockSpec((None, tq, S), lambda b, qi: (b, qi, 0)),
        ),
        compiler_params=pltpu.CompilerParams(
            dimension_semantics=("parallel", "parallel"),
            vmem_limit_bytes=_VMEM_LIMIT_BYTES),
    )(q4, kv5, kv5)


# ---------------------------------------------------------------------------
# Attention kernel B: need_weights=False (flash-style, K/V streamed in S chunks)
# ---------------------------------------------------------------------------

def _make_flash_attn_kernel(num_heads, head_dim, compute_dtype):
    def kernel(q_ref, k_ref, v_ref, o_ref, m_ref, l_ref, acc_ref):
        # q_ref: (H, tq, Dh)   k_ref/v_ref: (H, ts, Dh)   o_ref: (tq, E)
        # m_ref/l_ref: (H, tq, 1) f32   acc_ref: (H, tq, Dh) f32
        si = pl.program_id(2)

        @pl.when(si == 0)
        def _():
            m_ref[...] = jnp.full_like(m_ref, -jnp.inf)
            l_ref[...] = jnp.zeros_like(l_ref)
            acc_ref[...] = jnp.zeros_like(acc_ref)

        for h in range(num_heads):
            qh = q_ref[h].astype(compute_dtype)
            kh = k_ref[h].astype(compute_dtype)
            vh = v_ref[h].astype(compute_dtype)
            s = lax.dot_general(qh, kh, (((1,), (1,)), ((), ())),
                                preferred_element_type=jnp.float32)        # (tq, ts)
            m_prev = m_ref[h]
            m_new = jnp.maximum(m_prev, jnp.max(s, axis=-1, keepdims=True))
            alpha = jnp.exp(m_prev - m_new)
            p = jnp.exp(s - m_new)
            l_ref[h] = alpha * l_ref[h] + jnp.sum(p, axis=-1, keepdims=True)
            acc_ref[h] = alpha * acc_ref[h] + lax.dot_general(
                p.astype(compute_dtype), vh, (((1,), (0,)), ((), ())),
                preferred_element_type=jnp.float32)
            m_ref[h] = m_new

        @pl.when(si == pl.num_programs(2) - 1)
        def _():
            for h in range(num_heads):
                denom = l_ref[h]
                r = pl.reciprocal(denom, approx=True)
                r = r * (2.0 - denom * r)
                o_ref[:, h * head_dim:(h + 1) * head_dim] = (
                    acc_ref[h] * r).astype(o_ref.dtype)

    return kernel


def attention_flash(q4, kv5, *, tq=256, ts=512, compute_dtype=jnp.float32,
                    out_dtype=jnp.float32):
    """Flash-style attention (no probability output).  q4: (B,H,T,Dh); kv5: (2,B,H,S,Dh)."""
    B, H, T, Dh = q4.shape
    S = kv5.shape[3]
    E = H * Dh
    tq = _pick_divisor_tile(T, tq, 8)
    ts = _pick_divisor_tile(S, ts, 8)
    grid = (B, T // tq, S // ts)
    return pl.pallas_call(
        _make_flash_attn_kernel(H, Dh, compute_dtype),
        out_shape=jax.ShapeDtypeStruct((B, T, E), out_dtype),
        grid=grid,
        in_specs=[
            pl.BlockSpec((None, H, tq, Dh), lambda b, qi, si: (b, 0, qi, 0)),
            pl.BlockSpec((None, None, H, ts, Dh), lambda b, qi, si: (0, b, 0, si, 0)),  # K
            pl.BlockSpec((None, None, H, ts, Dh), lambda b, qi, si: (1, b, 0, si, 0)),  # V
        ],
        out_specs=pl.BlockSpec((None, tq, E), lambda b, qi, si: (b, qi, 0)),
        scratch_shapes=[
            pltpu.VMEM((H, tq, 1), jnp.float32),    # running max  m
            pltpu.VMEM((H, tq, 1), jnp.float32),    # running sum  l
            pltpu.VMEM((H, tq, Dh), jnp.float32),   # running acc
        ],
        compiler_params=pltpu.CompilerParams(
            dimension_semantics=("parallel", "parallel", "arbitrary"),
            vmem_limit_bytes=_VMEM_LIMIT_BYTES),
    )(q4, kv5, kv5)


# ---------------------------------------------------------------------------
# CrossAttention forward (glue around the kernels)
# ---------------------------------------------------------------------------

def pack_params(params, embed_dim, num_heads, d_tilde=1, param_dtype=jnp.float32):
    """One-time layout prep: fold q scaling, fuse K|V, pre-transpose all weights.
    Set param_dtype=jnp.bfloat16 on v6e/v7x for bf16-resident weights."""
    H = num_heads
    Dh = embed_dim // H
    scaling = (Dh / d_tilde) ** 0.5 / Dh   # == 1/sqrt(head_dim) for d_tilde=1
    return {
        "wq_t": (params["q_w"] * scaling).T.astype(param_dtype),                         # (E, E)
        "bq": (params["q_b"] * scaling).reshape(1, -1).astype(jnp.float32),              # (1, E)
        "wkv_t": jnp.concatenate([params["k_w"], params["v_w"]], axis=0).T
                 .astype(param_dtype),                                                   # (E, 2E)
        "bkv": jnp.concatenate([params["k_b"], params["v_b"]]).reshape(1, -1)
               .astype(jnp.float32),                                                     # (1, 2E)
        "wo_t": params["o_w"].T.astype(param_dtype),                                     # (E, E)
        "bo": params["o_b"].reshape(1, -1).astype(jnp.float32),                          # (1, E)
    }


def cross_attention_forward(query, condition, packed, num_heads, *,
                            need_weights=True, compute_dtype=jnp.float32,
                            tq=256, ts=512):
    T, B, E = query.shape
    S, Bc, Ec = condition.shape
    assert Bc == B and Ec == E
    H = num_heads
    Dh = E // H
    act_dtype = compute_dtype   # inter-kernel activation dtype (bf16 halves HBM traffic)

    # Batch-major + head-major internal layout; one amortized XLA transpose per tensor
    # at the kernel boundaries, contiguous per-head slabs inside the attention kernels.
    xq = query.transpose(1, 0, 2).reshape(B * T, E)
    xc = condition.transpose(1, 0, 2).reshape(B * S, E)

    q = linear(xq, packed["wq_t"], packed["bq"],
               compute_dtype=compute_dtype, out_dtype=act_dtype)        # (B*T, E)
    kv = linear(xc, packed["wkv_t"], packed["bkv"],
                compute_dtype=compute_dtype, out_dtype=act_dtype)       # (B*S, 2E)

    q4 = q.reshape(B, T, H, Dh).transpose(0, 2, 1, 3)                   # (B, H, T, Dh)
    kv5 = kv.reshape(B, S, 2, H, Dh).transpose(2, 0, 3, 1, 4)           # (2, B, H, S, Dh)

    if need_weights:
        attn, attn_weights = attention_with_weights(
            q4, kv5, tq=tq, compute_dtype=compute_dtype, out_dtype=act_dtype)
    else:
        attn = attention_flash(
            q4, kv5, tq=tq, ts=ts, compute_dtype=compute_dtype, out_dtype=act_dtype)
        attn_weights = None

    # TODO(synk): optionally fuse the output projection into the attention epilogue.
    out = linear(attn.reshape(B * T, E), packed["wo_t"], packed["bo"],
                 compute_dtype=compute_dtype, out_dtype=jnp.float32)
    out = out.reshape(B, T, E).transpose(1, 0, 2)                        # Time x Batch x Channel
    return out, attn_weights


# ---------------------------------------------------------------------------
# Deterministic parameter init (mirrors reset_parameters shapes/gains)
# ---------------------------------------------------------------------------

def xavier_uniform(key, shape, gain):
    fan_out, fan_in = shape
    a = gain * math.sqrt(6.0 / (fan_in + fan_out))
    return jax.random.uniform(key, shape, jnp.float32, -a, a)


def init_params(key, embed_dim, d_tilde=1):
    ks = jax.random.split(key, 6)
    g = 1.0 / math.sqrt(2 * d_tilde)      # qkv_same_dim branch
    bbound = 1.0 / math.sqrt(embed_dim)   # default nn.Linear bias init
    return {
        "k_w": xavier_uniform(ks[0], (embed_dim, embed_dim), g),
        "k_b": jnp.zeros((embed_dim,), jnp.float32),             # k_bias=False
        "v_w": xavier_uniform(ks[1], (embed_dim, embed_dim), g),
        "v_b": jax.random.uniform(ks[2], (embed_dim,), jnp.float32, -bbound, bbound),
        "q_w": xavier_uniform(ks[3], (embed_dim, embed_dim), g),
        "q_b": jax.random.uniform(ks[4], (embed_dim,), jnp.float32, -bbound, bbound),
        "o_w": xavier_uniform(ks[5], (embed_dim, embed_dim), 1.0 / math.sqrt(d_tilde)),
        "o_b": jnp.zeros((embed_dim,), jnp.float32),              # constant_(0.0)
    }


# Pure-JAX reference (same math as the PyTorch module, f32, no Pallas).
def reference_forward(query, condition, params, num_heads):
    T, B, E = query.shape
    S = condition.shape[0]
    H = num_heads
    Dh = E // H
    scaling = (Dh ** 0.5) / Dh
    q = (query @ params["q_w"].T + params["q_b"]) * scaling
    k = condition @ params["k_w"].T + params["k_b"]
    v = condition @ params["v_w"].T + params["v_b"]
    q = q.reshape(T, B * H, Dh).transpose(1, 0, 2)
    k = k.reshape(S, B * H, Dh).transpose(1, 0, 2)
    v = v.reshape(S, B * H, Dh).transpose(1, 0, 2)
    s = jnp.einsum("btd,bsd->bts", q, k)
    p = jax.nn.softmax(s, axis=-1)
    a = jnp.einsum("bts,bsd->btd", p, v)
    a = a.transpose(1, 0, 2).reshape(T, B, E)
    out = a @ params["o_w"].T + params["o_b"]
    w = p.reshape(B, H, T, S).mean(axis=1)
    return out, w


if __name__ == "__main__":
    # tgt_len = src_len = 16, batch = 2, embed_dim = 32, heads = 4 (head_dim = 8).
    T, B, E, H = 16, 2, 32, 4

    key = jax.random.PRNGKey(0)
    kq, kc, kp = jax.random.split(key, 3)
    query = jax.random.normal(kq, (T, B, E), jnp.float32)
    condition = jax.random.normal(kc, (T, B, E), jnp.float32)
    params = init_params(kp, E)
    packed = pack_params(params, E, H)     # one-time weight transpose / fusion

    # Small tiles (tq=ts=8) so the test exercises multiple query tiles and, for the
    # flash path, multiple streamed K/V chunks with online-softmax accumulation.
    fwd_w = jax.jit(lambda q, c: cross_attention_forward(
        q, c, packed, H, need_weights=True, tq=8))
    out, attn_w = fwd_w(query, condition)
    out = jax.block_until_ready(out)
    attn_w = jax.block_until_ready(attn_w)

    fwd_f = jax.jit(lambda q, c: cross_attention_forward(
        q, c, packed, H, need_weights=False, tq=8, ts=8)[0])
    out_f = jax.block_until_ready(fwd_f(query, condition))

    ref_out, ref_w = reference_forward(query, condition, params, H)
    assert out.shape == (T, B, E)
    assert attn_w.shape == (B, T, T)
    assert jnp.allclose(out, ref_out, atol=1e-4, rtol=1e-4), \
        float(jnp.max(jnp.abs(out - ref_out)))
    assert jnp.allclose(attn_w, ref_w, atol=1e-4, rtol=1e-4), \
        float(jnp.max(jnp.abs(attn_w - ref_w)))
    assert jnp.allclose(out_f, ref_out, atol=1e-4, rtol=1e-4), \
        float(jnp.max(jnp.abs(out_f - ref_out)))

    print("KERNEL_OK")
</pallas_src>

<mosaic_0001>
module attributes {stable_mosaic.version = 11 : i64} {
  func.func @kernel(%arg0: i32, %arg1: i32, %arg2: i32, %arg3: memref<32x32xf32, #tpu.memory_space<vmem>>, %arg4: memref<32x64xf32, #tpu.memory_space<vmem>>, %arg5: memref<1x64xf32, #tpu.memory_space<vmem>>, %arg6: memref<32x64xf32, #tpu.memory_space<vmem>>, %arg7: memref<32x64xf32, #tpu.memory_space<vmem>>) attributes {dimension_semantics = [#tpu.dimension_semantics<parallel>, #tpu.dimension_semantics<parallel>, #tpu.dimension_semantics<arbitrary>], iteration_bounds = array<i64: 1, 1, 1>, scalar_prefetch = 0 : i64, scratch_operands = 1 : i64, tpu.core_type = #tpu.core_type<tc>, window_params = [{transform_indices = @transform_0, window_bounds = array<i64: 32, 32>}, {transform_indices = @transform_1, window_bounds = array<i64: 32, 64>}, {transform_indices = @transform_2, window_bounds = array<i64: 1, 64>}, {transform_indices = @transform_3, window_bounds = array<i64: 32, 64>}]} {
    %c0_i32 = arith.constant 0 : i32
    %0 = arith.cmpi eq, %arg2, %c0_i32 : i32
    %1 = arith.extui %0 : i1 to i32
    %c0_i32_0 = arith.constant 0 : i32
    %2 = arith.cmpi ne, %1, %c0_i32_0 : i32
    scf.if %2 {
      %cst_10 = arith.constant 0.000000e+00 : f32
      %12 = vector.broadcast %cst_10 : f32 to vector<32x64xf32>
      %c0_11 = arith.constant 0 : index
      %c0_12 = arith.constant 0 : index
      %13 = vector.load %arg7[%c0_11, %c0_12] : memref<32x64xf32, #tpu.memory_space<vmem>>, vector<32x64xf32>
      tpu.vector_store %arg7[%c0_11, %c0_12], %12 {strides = array<i32>} : memref<32x64xf32, #tpu.memory_space<vmem>>, vector<32x64xf32>,
    } else {
    }
    %c0 = arith.constant 0 : index
    %c0_1 = arith.constant 0 : index
    %3 = vector.load %arg7[%c0, %c0_1] : memref<32x64xf32, #tpu.memory_space<vmem>>, vector<32x64xf32>
    %c0_2 = arith.constant 0 : index
    %c0_3 = arith.constant 0 : index
    %4 = vector.load %arg3[%c0_2, %c0_3] : memref<32x32xf32, #tpu.memory_space<vmem>>, vector<32x32xf32>
    %c0_4 = arith.constant 0 : index
    %c0_5 = arith.constant 0 : index
    %5 = vector.load %arg4[%c0_4, %c0_5] : memref<32x64xf32, #tpu.memory_space<vmem>>, vector<32x64xf32>
    %cst = arith.constant dense<0.000000e+00> : vector<32x64xf32>
    %6 = tpu.matmul %4, %5, %cst {dimension_numbers = #tpu.dot_dimension_numbers<[1], [0], [0], [1], [0, 0, 1, 1], [], []>} : vector<32x32xf32>, vector<32x64xf32>, vector<32x64xf32> -> vector<32x64xf32>
    %7 = arith.addf %3, %6 : vector<32x64xf32>
    %c0_6 = arith.constant 0 : index
    %c0_7 = arith.constant 0 : index
    %8 = vector.load %arg7[%c0_6, %c0_7] : memref<32x64xf32, #tpu.memory_space<vmem>>, vector<32x64xf32>
    tpu.vector_store %arg7[%c0_6, %c0_7], %7 {strides = array<i32>} : memref<32x64xf32, #tpu.memory_space<vmem>>, vector<32x64xf32>,
    %c0_i32_8 = arith.constant 0 : i32
    %9 = arith.cmpi eq, %arg2, %c0_i32_8 : i32
    %10 = arith.extui %9 : i1 to i32
    %c0_i32_9 = arith.constant 0 : i32
    %11 = arith.cmpi ne, %10, %c0_i32_9 : i32
    scf.if %11 {
      %c0_10 = arith.constant 0 : index
      %c0_11 = arith.constant 0 : index
      %12 = vector.load %arg7[%c0_10, %c0_11] : memref<32x64xf32, #tpu.memory_space<vmem>>, vector<32x64xf32>
      %c0_12 = arith.constant 0 : index
      %c0_13 = arith.constant 0 : index
      %13 = vector.load %arg5[%c0_12, %c0_13] : memref<1x64xf32, #tpu.memory_space<vmem>>, vector<1x64xf32>
      %14 = vector.broadcast %13 : vector<1x64xf32> to vector<32x64xf32>
      %15 = arith.addf %12, %14 : vector<32x64xf32>
      %c0_14 = arith.constant 0 : index
      %c0_15 = arith.constant 0 : index
      %16 = vector.load %arg6[%c0_14, %c0_15] : memref<32x64xf32, #tpu.memory_space<vmem>>, vector<32x64xf32>
      tpu.vector_store %arg6[%c0_14, %c0_15], %15 {strides = array<i32>} : memref<32x64xf32, #tpu.memory_space<vmem>>, vector<32x64xf32>,
    } else {
    }
    return
  }
  func.func @transform_0(%arg0: i32, %arg1: i32, %arg2: i32) -> (i32, i32) {
    %c0_i32 = arith.constant 0 : i32
    return %arg0, %arg2 : i32, i32
  }
  func.func @transform_1(%arg0: i32, %arg1: i32, %arg2: i32) -> (i32, i32) {
    %c0_i32 = arith.constant 0 : i32
    return %arg2, %arg1 : i32, i32
  }
  func.func @transform_2(%arg0: i32, %arg1: i32, %arg2: i32) -> (i32, i32) {
    %c0_i32 = arith.constant 0 : i32
    %c0_i32_0 = arith.constant 0 : i32
    return %c0_i32, %arg1 : i32, i32
  }
  func.func @transform_3(%arg0: i32, %arg1: i32, %arg2: i32) -> (i32, i32) {
    %c0_i32 = arith.constant 0 : i32
    return %arg0, %arg1 : i32, i32
  }
}

module attributes {stable_mosaic.version = 11 : i64} {
  func.func @kernel(%arg0: i32, %arg1: i32, %arg2: i32, %arg3: memref<32x32xf32, #tpu.memory_space<vmem>>, %arg4: memref<32x32xf32, #tpu.memory_space<vmem>>, %arg5: memref<1x32xf32, #tpu.memory_space<vmem>>, %arg6: memref<32x32xf32, #tpu.memory_space<vmem>>, %arg7: memref<32x32xf32, #tpu.memory_space<vmem>>) attributes {dimension_semantics = [#tpu.dimension_semantics<parallel>, #tpu.dimension_semantics<parallel>, #tpu.dimension_semantics<arbitrary>], iteration_bounds = array<i64: 1, 1, 1>, scalar_prefetch = 0 : i64, scratch_operands = 1 : i64, tpu.core_type = #tpu.core_type<tc>, window_params = [{transform_indices = @transform_0, window_bounds = array<i64: 32, 32>}, {transform_indices = @transform_1, window_bounds = array<i64: 32, 32>}, {transform_indices = @transform_2, window_bounds = array<i64: 1, 32>}, {transform_indices = @transform_3, window_bounds = array<i64: 32, 32>}]} {
    %c0_i32 = arith.constant 0 : i32
    %0 = arith.cmpi eq, %arg2, %c0_i32 : i32
    %1 = arith.extui %0 : i1 to i32
    %c0_i32_0 = arith.constant 0 : i32
    %2 = arith.cmpi ne, %1, %c0_i32_0 : i32
    scf.if %2 {
      %cst_10 = arith.constant 0.000000e+00 : f32
      %12 = vector.broadcast %cst_10 : f32 to vector<32x32xf32>
      %c0_11 = arith.constant 0 : index
      %c0_12 = arith.constant 0 : index
      %13 = vector.load %arg7[%c0_11, %c0_12] : memref<32x32xf32, #tpu.memory_space<vmem>>, vector<32x32xf32>
      tpu.vector_store %arg7[%c0_11, %c0_12], %12 {strides = array<i32>} : memref<32x32xf32, #tpu.memory_space<vmem>>, vector<32x32xf32>,
    } else {
    }
    %c0 = arith.constant 0 : index
    %c0_1 = arith.constant 0 : index
    %3 = vector.load %arg7[%c0, %c0_1] : memref<32x32xf32, #tpu.memory_space<vmem>>, vector<32x32xf32>
    %c0_2 = arith.constant 0 : index
    %c0_3 = arith.constant 0 : index
    %4 = vector.load %arg3[%c0_2, %c0_3] : memref<32x32xf32, #tpu.memory_space<vmem>>, vector<32x32xf32>
    %c0_4 = arith.constant 0 : index
    %c0_5 = arith.constant 0 : index
    %5 = vector.load %arg4[%c0_4, %c0_5] : memref<32x32xf32, #tpu.memory_space<vmem>>, vector<32x32xf32>
    %cst = arith.constant dense<0.000000e+00> : vector<32x32xf32>
    %6 = tpu.matmul %4, %5, %cst {dimension_numbers = #tpu.dot_dimension_numbers<[1], [0], [0], [1], [0, 0, 1, 1], [], []>} : vector<32x32xf32>, vector<32x32xf32>, vector<32x32xf32> -> vector<32x32xf32>
    %7 = arith.addf %3, %6 : vector<32x32xf32>
    %c0_6 = arith.constant 0 : index
    %c0_7 = arith.constant 0 : index
    %8 = vector.load %arg7[%c0_6, %c0_7] : memref<32x32xf32, #tpu.memory_space<vmem>>, vector<32x32xf32>
    tpu.vector_store %arg7[%c0_6, %c0_7], %7 {strides = array<i32>} : memref<32x32xf32, #tpu.memory_space<vmem>>, vector<32x32xf32>,
    %c0_i32_8 = arith.constant 0 : i32
    %9 = arith.cmpi eq, %arg2, %c0_i32_8 : i32
    %10 = arith.extui %9 : i1 to i32
    %c0_i32_9 = arith.constant 0 : i32
    %11 = arith.cmpi ne, %10, %c0_i32_9 : i32
    scf.if %11 {
      %c0_10 = arith.constant 0 : index
      %c0_11 = arith.constant 0 : index
      %12 = vector.load %arg7[%c0_10, %c0_11] : memref<32x32xf32, #tpu.memory_space<vmem>>, vector<32x32xf32>
      %c0_12 = arith.constant 0 : index
      %c0_13 = arith.constant 0 : index
      %13 = vector.load %arg5[%c0_12, %c0_13] : memref<1x32xf32, #tpu.memory_space<vmem>>, vector<1x32xf32>
      %14 = vector.broadcast %13 : vector<1x32xf32> to vector<32x32xf32>
      %15 = arith.addf %12, %14 : vector<32x32xf32>
      %c0_14 = arith.constant 0 : index
      %c0_15 = arith.constant 0 : index
      %16 = vector.load %arg6[%c0_14, %c0_15] : memref<32x32xf32, #tpu.memory_space<vmem>>, vector<32x32xf32>
      tpu.vector_store %arg6[%c0_14, %c0_15], %15 {strides = array<i32>} : memref<32x32xf32, #tpu.memory_space<vmem>>, vector<32x32xf32>,
    } else {
    }
    return
  }
  func.func @transform_0(%arg0: i32, %arg1: i32, %arg2: i32) -> (i32, i32) {
    %c0_i32 = arith.constant 0 : i32
    return %arg0, %arg2 : i32, i32
  }
  func.func @transform_1(%arg0: i32, %arg1: i32, %arg2: i32) -> (i32, i32) {
    %c0_i32 = arith.constant 0 : i32
    return %arg2, %arg1 : i32, i32
  }
  func.func @transform_2(%arg0: i32, %arg1: i32, %arg2: i32) -> (i32, i32) {
    %c0_i32 = arith.constant 0 : i32
    %c0_i32_0 = arith.constant 0 : i32
    return %c0_i32, %arg1 : i32, i32
  }
  func.func @transform_3(%arg0: i32, %arg1: i32, %arg2: i32) -> (i32, i32) {
    %c0_i32 = arith.constant 0 : i32
    return %arg0, %arg1 : i32, i32
  }
}

module attributes {stable_mosaic.version = 11 : i64} {
  func.func @kernel(%arg0: i32, %arg1: i32, %arg2: memref<1x4x8x8xf32, #tpu.memory_space<vmem>>, %arg3: memref<1x1x4x16x8xf32, #tpu.memory_space<vmem>>, %arg4: memref<1x1x4x16x8xf32, #tpu.memory_space<vmem>>, %arg5: memref<1x8x32xf32, #tpu.memory_space<vmem>>, %arg6: memref<1x8x16xf32, #tpu.memory_space<vmem>>) attributes {dimension_semantics = [#tpu.dimension_semantics<parallel>, #tpu.dimension_semantics<parallel>], iteration_bounds = array<i64: 2, 2>, scalar_prefetch = 0 : i64, scratch_operands = 0 : i64, tpu.core_type = #tpu.core_type<tc>, window_params = [{transform_indices = @transform_0, window_bounds = array<i64: 1, 4, 8, 8>}, {transform_indices = @transform_1, window_bounds = array<i64: 1, 1, 4, 16, 8>}, {transform_indices = @transform_2, window_bounds = array<i64: 1, 1, 4, 16, 8>}, {transform_indices = @transform_3, window_bounds = array<i64: 1, 8, 32>}, {transform_indices = @transform_4, window_bounds = array<i64: 1, 8, 16>}]} {
    %c0 = arith.constant 0 : index
    %c0_0 = arith.constant 0 : index
    %c0_1 = arith.constant 0 : index
    %c0_2 = arith.constant 0 : index
    %0 = vector.load %arg2[%c0, %c0_0, %c0_1, %c0_2] : memref<1x4x8x8xf32, #tpu.memory_space<vmem>>, vector<1x1x8x8xf32>
    %1 = vector.shape_cast %0 : vector<1x1x8x8xf32> to vector<8x8xf32>
    %c0_3 = arith.constant 0 : index
    %c0_4 = arith.constant 0 : index
    %c0_5 = arith.constant 0 : index
    %c0_6 = arith.constant 0 : index
    %c0_7 = arith.constant 0 : index
    %2 = vector.load %arg3[%c0_3, %c0_4, %c0_5, %c0_6, %c0_7] : memref<1x1x4x16x8xf32, #tpu.memory_space<vmem>>, vector<1x1x1x16x8xf32>
    %3 = vector.shape_cast %2 : vector<1x1x1x16x8xf32> to vector<16x8xf32>
    %c0_8 = arith.constant 0 : index
    %c0_9 = arith.constant 0 : index
    %c0_10 = arith.constant 0 : index
    %c0_11 = arith.constant 0 : index
    %c0_12 = arith.constant 0 : index
    %4 = vector.load %arg4[%c0_8, %c0_9, %c0_10, %c0_11, %c0_12] : memref<1x1x4x16x8xf32, #tpu.memory_space<vmem>>, vector<1x1x1x16x8xf32>
    %5 = vector.shape_cast %4 : vector<1x1x1x16x8xf32> to vector<16x8xf32>
    %cst = arith.constant dense<0.000000e+00> : vector<8x16xf32>
    %6 = tpu.matmul %1, %3, %cst {dimension_numbers = #tpu.dot_dimension_numbers<[1], [1], [0], [0], [0, 0, 1, 0], [], []>} : vector<8x8xf32>, vector<16x8xf32>, vector<8x16xf32> -> vector<8x16xf32>
    %cst_13 = arith.constant dense<0xFF800000> : vector<8xf32>
    %7 = vector.multi_reduction <maximumf>, %6, %cst_13 [1] : vector<8x16xf32> to vector<8xf32>
    %8 = vector.shape_cast %7 : vector<8xf32> to vector<8x1xf32>
    %9 = vector.broadcast %8 : vector<8x1xf32> to vector<8x16xf32>
    %10 = arith.subf %6, %9 : vector<8x16xf32>
    %11 = math.exp %10 : vector<8x16xf32>
    %cst_14 = arith.constant dense<0.000000e+00> : vector<8xf32>
    %12 = vector.multi_reduction <add>, %11, %cst_14 [1] : vector<8x16xf32> to vector<8xf32>
    %13 = vector.shape_cast %12 : vector<8xf32> to vector<8x1xf32>
    %14 = tpu.reciprocal %13 {approx = true} : vector<8x1xf32> -> vector<8x1xf32>
    %15 = arith.mulf %13, %14 : vector<8x1xf32>
    %cst_15 = arith.constant 2.000000e+00 : f32
    %16 = vector.broadcast %cst_15 : f32 to vector<8x1xf32>
    %17 = arith.subf %16, %15 : vector<8x1xf32>
    %18 = arith.mulf %14, %17 : vector<8x1xf32>
    %19 = vector.broadcast %18 : vector<8x1xf32> to vector<8x16xf32>
    %20 = arith.mulf %11, %19 : vector<8x16xf32>
    %cst_16 = arith.constant dense<0.000000e+00> : vector<8x8xf32>
    %21 = tpu.matmul %20, %5, %cst_16 {dimension_numbers = #tpu.dot_dimension_numbers<[1], [0], [0], [1], [0, 0, 1, 1], [], []>} : vector<8x16xf32>, vector<16x8xf32>, vector<8x8xf32> -> vector<8x8xf32>
    %c0_17 = arith.constant 0 : index
    %c0_18 = arith.constant 0 : index
    %c0_19 = arith.constant 0 : index
    %22 = vector.load %arg5[%c0_17, %c0_18, %c0_19] : memref<1x8x32xf32, #tpu.memory_space<vmem>>, vector<1x8x8xf32>
    %23 = vector.shape_cast %22 : vector<1x8x8xf32> to vector<8x8xf32>
    %24 = vector.shape_cast %21 : vector<8x8xf32> to vector<1x8x8xf32>
    tpu.vector_store %arg5[%c0_17, %c0_18, %c0_19], %24 {strides = array<i32>} : memref<1x8x32xf32, #tpu.memory_space<vmem>>, vector<1x8x8xf32>,
    %c0_20 = arith.constant 0 : index
    %c0_21 = arith.constant 0 : index
    %c0_22 = arith.constant 0 : index
    %25 = vector.load %arg6[%c0_20, %c0_21, %c0_22] : memref<1x8x16xf32, #tpu.memory_space<vmem>>, vector<1x8x16xf32>
    %26 = vector.shape_cast %25 : vector<1x8x16xf32> to vector<8x16xf32>
    %27 = vector.shape_cast %20 : vector<8x16xf32> to vector<1x8x16xf32>
    tpu.vector_store %arg6[%c0_20, %c0_21, %c0_22], %27 {strides = array<i32>} : memref<1x8x16xf32, #tpu.memory_space<vmem>>, vector<1x8x16xf32>,
    %c0_23 = arith.constant 0 : index
    %c1 = arith.constant 1 : index
    %c0_24 = arith.constant 0 : index
    %c0_25 = arith.constant 0 : index
    %28 = vector.load %arg2[%c0_23, %c1, %c0_24, %c0_25] : memref<1x4x8x8xf32, #tpu.memory_space<vmem>>, vector<1x1x8x8xf32>
    %29 = vector.shape_cast %28 : vector<1x1x8x8xf32> to vector<8x8xf32>
    %c0_26 = arith.constant 0 : index
    %c0_27 = arith.constant 0 : index
    %c1_28 = arith.constant 1 : index
    %c0_29 = arith.constant 0 : index
    %c0_30 = arith.constant 0 : index
    %30 = vector.load %arg3[%c0_26, %c0_27, %c1_28, %c0_29, %c0_30] : memref<1x1x4x16x8xf32, #tpu.memory_space<vmem>>, vector<1x1x1x16x8xf32>
    %31 = vector.shape_cast %30 : vector<1x1x1x16x8xf32> to vector<16x8xf32>
    %c0_31 = arith.constant 0 : index
    %c0_32 = arith.constant 0 : index
    %c1_33 = arith.constant 1 : index
    %c0_34 = arith.constant 0 : index
    %c0_35 = arith.constant 0 : index
    %32 = vector.load %arg4[%c0_31, %c0_32, %c1_33, %c0_34, %c0_35] : memref<1x1x4x16x8xf32, #tpu.memory_space<vmem>>, vector<1x1x1x16x8xf32>
    %33 = vector.shape_cast %32 : vector<1x1x1x16x8xf32> to vector<16x8xf32>
    %cst_36 = arith.constant dense<0.000000e+00> : vector<8x16xf32>
    %34 = tpu.matmul %29, %31, %cst_36 {dimension_numbers = #tpu.dot_dimension_numbers<[1], [1], [0], [0], [0, 0, 1, 0], [], []>} : vector<8x8xf32>, vector<16x8xf32>, vector<8x16xf32> -> vector<8x16xf32>
    %cst_37 = arith.constant dense<0xFF800000> : vector<8xf32>
    %35 = vector.multi_reduction <maximumf>, %34, %cst_37 [1] : vector<8x16xf32> to vector<8xf32>
    %36 = vector.shape_cast %35 : vector<8xf32> to vector<8x1xf32>
    %37 = vector.broadcast %36 : vector<8x1xf32> to vector<8x16xf32>
    %38 = arith.subf %34, %37 : vector<8x16xf32>
    %39 = math.exp %38 : vector<8x16xf32>
    %cst_38 = arith.constant dense<0.000000e+00> : vector<8xf32>
    %40 = vector.multi_reduction <add>, %39, %cst_38 [1] : vector<8x16xf32> to vector<8xf32>
    %41 = vector.shape_cast %40 : vector<8xf32> to vector<8x1xf32>
    %42 = tpu.reciprocal %41 {approx = true} : vector<8x1xf32> -> vector<8x1xf32>
    %43 = arith.mulf %41, %42 : vector<8x1xf32>
    %cst_39 = arith.constant 2.000000e+00 : f32
    %44 = vector.broadcast %cst_39 : f32 to vector<8x1xf32>
    %45 = arith.subf %44, %43 : vector<8x1xf32>
    %46 = arith.mulf %42, %45 : vector<8x1xf32>
    %47 = vector.broadcast %46 : vector<8x1xf32> to vector<8x16xf32>
    %48 = arith.mulf %39, %47 : vector<8x16xf32>
    %cst_40 = arith.constant dense<0.000000e+00> : vector<8x8xf32>
    %49 = tpu.matmul %48, %33, %cst_40 {dimension_numbers = #tpu.dot_dimension_numbers<[1], [0], [0], [1], [0, 0, 1, 1], [], []>} : vector<8x16xf32>, vector<16x8xf32>, vector<8x8xf32> -> vector<8x8xf32>
    %c0_41 = arith.constant 0 : index
    %c0_42 = arith.constant 0 : index
    %c8 = arith.constant 8 : index
    %50 = vector.load %arg5[%c0_41, %c0_42, %c8] : memref<1x8x32xf32, #tpu.memory_space<vmem>>, vector<1x8x8xf32>
    %51 = vector.shape_cast %50 : vector<1x8x8xf32> to vector<8x8xf32>
    %52 = vector.shape_cast %49 : vector<8x8xf32> to vector<1x8x8xf32>
    tpu.vector_store %arg5[%c0_41, %c0_42, %c8], %52 {strides = array<i32>} : memref<1x8x32xf32, #tpu.memory_space<vmem>>, vector<1x8x8xf32>,
    %c0_43 = arith.constant 0 : index
    %c0_44 = arith.constant 0 : index
    %c0_45 = arith.constant 0 : index
    %53 = vector.load %arg6[%c0_43, %c0_44, %c0_45] : memref<1x8x16xf32, #tpu.memory_space<vmem>>, vector<1x8x16xf32>
    %54 = vector.shape_cast %53 : vector<1x8x16xf32> to vector<8x16xf32>
    %55 = arith.addf %54, %48 : vector<8x16xf32>
    %c0_46 = arith.constant 0 : index
    %c0_47 = arith.constant 0 : index
    %c0_48 = arith.constant 0 : index
    %56 = vector.load %arg6[%c0_46, %c0_47, %c0_48] : memref<1x8x16xf32, #tpu.memory_space<vmem>>, vector<1x8x16xf32>
    %57 = vector.shape_cast %56 : vector<1x8x16xf32> to vector<8x16xf32>
    %58 = vector.shape_cast %55 : vector<8x16xf32> to vector<1x8x16xf32>
    tpu.vector_store %arg6[%c0_46, %c0_47, %c0_48], %58 {strides = array<i32>} : memref<1x8x16xf32, #tpu.memory_space<vmem>>, vector<1x8x16xf32>,
    %c0_49 = arith.constant 0 : index
    %c2 = arith.constant 2 : index
    %c0_50 = arith.constant 0 : index
    %c0_51 = arith.constant 0 : index
    %59 = vector.load %arg2[%c0_49, %c2, %c0_50, %c0_51] : memref<1x4x8x8xf32, #tpu.memory_space<vmem>>, vector<1x1x8x8xf32>
    %60 = vector.shape_cast %59 : vector<1x1x8x8xf32> to vector<8x8xf32>
    %c0_52 = arith.constant 0 : index
    %c0_53 = arith.constant 0 : index
    %c2_54 = arith.constant 2 : index
    %c0_55 = arith.constant 0 : index
    %c0_56 = arith.constant 0 : index
    %61 = vector.load %arg3[%c0_52, %c0_53, %c2_54, %c0_55, %c0_56] : memref<1x1x4x16x8xf32, #tpu.memory_space<vmem>>, vector<1x1x1x16x8xf32>
    %62 = vector.shape_cast %61 : vector<1x1x1x16x8xf32> to vector<16x8xf32>
    %c0_57 = arith.constant 0 : index
    %c0_58 = arith.constant 0 : index
    %c2_59 = arith.constant 2 : index
    %c0_60 = arith.constant 0 : index
    %c0_61 = arith.constant 0 : index
    %63 = vector.load %arg4[%c0_57, %c0_58, %c2_59, %c0_60, %c0_61] : memref<1x1x4x16x8xf32, #tpu.memory_space<vmem>>, vector<1x1x1x16x8xf32>
    %64 = vector.shape_cast %63 : vector<1x1x1x16x8xf32> to vector<16x8xf32>
    %cst_62 = arith.constant dense<0.000000e+00> : vector<8x16xf32>
    %65 = tpu.matmul %60, %62, %cst_62 {dimension_numbers = #tpu.dot_dimension_numbers<[1], [1], [0], [0], [0, 0, 1, 0], [], []>} : vector<8x8xf32>, vector<16x8xf32>, vector<8x16xf32> -> vector<8x16xf32>
    %cst_63 = arith.constant dense<0xFF800000> : vector<8xf32>
    %66 = vector.multi_reduction <maximumf>, %65, %cst_63 [1] : vector<8x16xf32> to vector<8xf32>
    %67 = vector.shape_cast %66 : vector<8xf32> to vector<8x1xf32>
    %68 = vector.broadcast %67 : vector<8x1xf32> to vector<8x16xf32>
    %69 = arith.subf %65, %68 : vector<8x16xf32>
    %70 = math.exp %69 : vector<8x16xf32>
    %cst_64 = arith.constant dense<0.000000e+00> : vector<8xf32>
    %71 = vector.multi_reduction <add>, %70, %cst_64 [1] : vector<8x16xf32> to vector<8xf32>
    %72 = vector.shape_cast %71 : vector<8xf32> to vector<8x1xf32>
    %73 = tpu.reciprocal %72 {approx = true} : vector<8x1xf32> -> vector<8x1xf32>
    %74 = arith.mulf %72, %73 : vector<8x1xf32>
    %cst_65 = arith.constant 2.000000e+00 : f32
    %75 = vector.broadcast %cst_65 : f32 to vector<8x1xf32>
    %76 = arith.subf %75, %74 : vector<8x1xf32>
    %77 = arith.mulf %73, %76 : vector<8x1xf32>
    %78 = vector.broadcast %77 : vector<8x1xf32> to vector<8x16xf32>
    %79 = arith.mulf %70, %78 : vector<8x16xf32>
    %cst_66 = arith.constant dense<0.000000e+00> : vector<8x8xf32>
    %80 = tpu.matmul %79, %64, %cst_66 {dimension_numbers = #tpu.dot_dimension_numbers<[1], [0], [0], [1], [0, 0, 1, 1], [], []>} : vector<8x16xf32>, vector<16x8xf32>, vector<8x8xf32> -> vector<8x8xf32>
    %c0_67 = arith.constant 0 : index
    %c0_68 = arith.constant 0 : index
    %c16 = arith.constant 16 : index
    %81 = vector.load %arg5[%c0_67, %c0_68, %c16] : memref<1x8x32xf32, #tpu.memory_space<vmem>>, vector<1x8x8xf32>
    %82 = vector.shape_cast %81 : vector<1x8x8xf32> to vector<8x8xf32>
    %83 = vector.shape_cast %80 : vector<8x8xf32> to vector<1x8x8xf32>
    tpu.vector_store %arg5[%c0_67, %c0_68, %c16], %83 {strides = array<i32>} : memref<1x8x32xf32, #tpu.memory_space<vmem>>, vector<1x8x8xf32>,
    %c0_69 = arith.constant 0 : index
    %c0_70 = arith.constant 0 : index
    %c0_71 = arith.constant 0 : index
    %84 = vector.load %arg6[%c0_69, %c0_70, %c0_71] : memref<1x8x16xf32, #tpu.memory_space<vmem>>, vector<1x8x16xf32>
    %85 = vector.shape_cast %84 : vector<1x8x16xf32> to vector<8x16xf32>
    %86 = arith.addf %85, %79 : vector<8x16xf32>
    %c0_72 = arith.constant 0 : index
    %c0_73 = arith.constant 0 : index
    %c0_74 = arith.constant 0 : index
    %87 = vector.load %arg6[%c0_72, %c0_73, %c0_74] : memref<1x8x16xf32, #tpu.memory_space<vmem>>, vector<1x8x16xf32>
    %88 = vector.shape_cast %87 : vector<1x8x16xf32> to vector<8x16xf32>
    %89 = vector.shape_cast %86 : vector<8x16xf32> to vector<1x8x16xf32>
    tpu.vector_store %arg6[%c0_72, %c0_73, %c0_74], %89 {strides = array<i32>} : memref<1x8x16xf32, #tpu.memory_space<vmem>>, vector<1x8x16xf32>,
    %c0_75 = arith.constant 0 : index
    %c3 = arith.constant 3 : index
    %c0_76 = arith.constant 0 : index
    %c0_77 = arith.constant 0 : index
    %90 = vector.load %arg2[%c0_75, %c3, %c0_76, %c0_77] : memref<1x4x8x8xf32, #tpu.memory_space<vmem>>, vector<1x1x8x8xf32>
    %91 = vector.shape_cast %90 : vector<1x1x8x8xf32> to vector<8x8xf32>
    %c0_78 = arith.constant 0 : index
    %c0_79 = arith.constant 0 : index
    %c3_80 = arith.constant 3 : index
    %c0_81 = arith.constant 0 : index
    %c0_82 = arith.constant 0 : index
    %92 = vector.load %arg3[%c0_78, %c0_79, %c3_80, %c0_81, %c0_82] : memref<1x1x4x16x8xf32, #tpu.memory_space<vmem>>, vector<1x1x1x16x8xf32>
    %93 = vector.shape_cast %92 : vector<1x1x1x16x8xf32> to vector<16x8xf32>
    %c0_83 = arith.constant 0 : index
    %c0_84 = arith.constant 0 : index
    %c3_85 = arith.constant 3 : index
    %c0_86 = arith.constant 0 : index
    %c0_87 = arith.constant 0 : index
    %94 = vector.load %arg4[%c0_83, %c0_84, %c3_85, %c0_86, %c0_87] : memref<1x1x4x16x8xf32, #tpu.memory_space<vmem>>, vector<1x1x1x16x8xf32>
    %95 = vector.shape_cast %94 : vector<1x1x1x16x8xf32> to vector<16x8xf32>
    %cst_88 = arith.constant dense<0.000000e+00> : vector<8x16xf32>
    %96 = tpu.matmul %91, %93, %cst_88 {dimension_numbers = #tpu.dot_dimension_numbers<[1], [1], [0], [0], [0, 0, 1, 0], [], []>} : vector<8x8xf32>, vector<16x8xf32>, vector<8x16xf32> -> vector<8x16xf32>
    %cst_89 = arith.constant dense<0xFF800000> : vector<8xf32>
    %97 = vector.multi_reduction <maximumf>, %96, %cst_89 [1] : vector<8x16xf32> to vector<8xf32>
    %98 = vector.shape_cast %97 : vector<8xf32> to vector<8x1xf32>
    %99 = vector.broadcast %98 : vector<8x1xf32> to vector<8x16xf32>
    %100 = arith.subf %96, %99 : vector<8x16xf32>
    %101 = math.exp %100 : vector<8x16xf32>
    %cst_90 = arith.constant dense<0.000000e+00> : vector<8xf32>
    %102 = vector.multi_reduction <add>, %101, %cst_90 [1] : vector<8x16xf32> to vector<8xf32>
    %103 = vector.shape_cast %102 : vector<8xf32> to vector<8x1xf32>
    %104 = tpu.reciprocal %103 {approx = true} : vector<8x1xf32> -> vector<8x1xf32>
    %105 = arith.mulf %103, %104 : vector<8x1xf32>
    %cst_91 = arith.constant 2.000000e+00 : f32
    %106 = vector.broadcast %cst_91 : f32 to vector<8x1xf32>
    %107 = arith.subf %106, %105 : vector<8x1xf32>
    %108 = arith.mulf %104, %107 : vector<8x1xf32>
    %109 = vector.broadcast %108 : vector<8x1xf32> to vector<8x16xf32>
    %110 = arith.mulf %101, %109 : vector<8x16xf32>
    %cst_92 = arith.constant dense<0.000000e+00> : vector<8x8xf32>
    %111 = tpu.matmul %110, %95, %cst_92 {dimension_numbers = #tpu.dot_dimension_numbers<[1], [0], [0], [1], [0, 0, 1, 1], [], []>} : vector<8x16xf32>, vector<16x8xf32>, vector<8x8xf32> -> vector<8x8xf32>
    %c0_93 = arith.constant 0 : index
    %c0_94 = arith.constant 0 : index
    %c24 = arith.constant 24 : index
    %112 = vector.load %arg5[%c0_93, %c0_94, %c24] : memref<1x8x32xf32, #tpu.memory_space<vmem>>, vector<1x8x8xf32>
    %113 = vector.shape_cast %112 : vector<1x8x8xf32> to vector<8x8xf32>
    %114 = vector.shape_cast %111 : vector<8x8xf32> to vector<1x8x8xf32>
    tpu.vector_store %arg5[%c0_93, %c0_94, %c24], %114 {strides = array<i32>} : memref<1x8x32xf32, #tpu.memory_space<vmem>>, vector<1x8x8xf32>,
    %c0_95 = arith.constant 0 : index
    %c0_96 = arith.constant 0 : index
    %c0_97 = arith.constant 0 : index
    %115 = vector.load %arg6[%c0_95, %c0_96, %c0_97] : memref<1x8x16xf32, #tpu.memory_space<vmem>>, vector<1x8x16xf32>
    %116 = vector.shape_cast %115 : vector<1x8x16xf32> to vector<8x16xf32>
    %117 = arith.addf %116, %110 : vector<8x16xf32>
    %c0_98 = arith.constant 0 : index
    %c0_99 = arith.constant 0 : index
    %c0_100 = arith.constant 0 : index
    %118 = vector.load %arg6[%c0_98, %c0_99, %c0_100] : memref<1x8x16xf32, #tpu.memory_space<vmem>>, vector<1x8x16xf32>
    %119 = vector.shape_cast %118 : vector<1x8x16xf32> to vector<8x16xf32>
    %120 = vector.shape_cast %117 : vector<8x16xf32> to vector<1x8x16xf32>
    tpu.vector_store %arg6[%c0_98, %c0_99, %c0_100], %120 {strides = array<i32>} : memref<1x8x16xf32, #tpu.memory_space<vmem>>, vector<1x8x16xf32>,
    %c0_101 = arith.constant 0 : index
    %c0_102 = arith.constant 0 : index
    %c0_103 = arith.constant 0 : index
    %121 = vector.load %arg6[%c0_101, %c0_102, %c0_103] : memref<1x8x16xf32, #tpu.memory_space<vmem>>, vector<1x8x16xf32>
    %122 = vector.shape_cast %121 : vector<1x8x16xf32> to vector<8x16xf32>
    %cst_104 = arith.constant 2.500000e-01 : f32
    %123 = vector.broadcast %cst_104 : f32 to vector<8x16xf32>
    %124 = arith.mulf %122, %123 : vector<8x16xf32>
    %c0_105 = arith.constant 0 : index
    %c0_106 = arith.constant 0 : index
    %c0_107 = arith.constant 0 : index
    %125 = vector.load %arg6[%c0_105, %c0_106, %c0_107] : memref<1x8x16xf32, #tpu.memory_space<vmem>>, vector<1x8x16xf32>
    %126 = vector.shape_cast %125 : vector<1x8x16xf32> to vector<8x16xf32>
    %127 = vector.shape_cast %124 : vector<8x16xf32> to vector<1x8x16xf32>
    tpu.vector_store %arg6[%c0_105, %c0_106, %c0_107], %127 {strides = array<i32>} : memref<1x8x16xf32, #tpu.memory_space<vmem>>, vector<1x8x16xf32>,
    return
  }
  func.func @transform_0(%arg0: i32, %arg1: i32) -> (i32, i32, i32, i32) {
    %c0_i32 = arith.constant 0 : i32
    %c0_i32_0 = arith.constant 0 : i32
    %c0_i32_1 = arith.constant 0 : i32
    return %arg0, %c0_i32, %arg1, %c0_i32_0 : i32, i32, i32, i32
  }
  func.func @transform_1(%arg0: i32, %arg1: i32) -> (i32, i32, i32, i32, i32) {
    %c0_i32 = arith.constant 0 : i32
    %c0_i32_0 = arith.constant 0 : i32
    %c0_i32_1 = arith.constant 0 : i32
    %c0_i32_2 = arith.constant 0 : i32
    %c0_i32_3 = arith.constant 0 : i32
    return %c0_i32, %arg0, %c0_i32_0, %c0_i32_1, %c0_i32_2 : i32, i32, i32, i32, i32
  }
  func.func @transform_2(%arg0: i32, %arg1: i32) -> (i32, i32, i32, i32, i32) {
    %c1_i32 = arith.constant 1 : i32
    %c0_i32 = arith.constant 0 : i32
    %c0_i32_0 = arith.constant 0 : i32
    %c0_i32_1 = arith.constant 0 : i32
    %c0_i32_2 = arith.constant 0 : i32
    return %c1_i32, %arg0, %c0_i32, %c0_i32_0, %c0_i32_1 : i32, i32, i32, i32, i32
  }
  func.func @transform_3(%arg0: i32, %arg1: i32) -> (i32, i32, i32) {
    %c0_i32 = arith.constant 0 : i32
    %c0_i32_0 = arith.constant 0 : i32
    return %arg0, %arg1, %c0_i32 : i32, i32, i32
  }
  func.func @transform_4(%arg0: i32, %arg1: i32) -> (i32, i32, i32) {
    %c0_i32 = arith.constant 0 : i32
    %c0_i32_0 = arith.constant 0 : i32
    return %arg0, %arg1, %c0_i32 : i32, i32, i32
  }
}

</mosaic_0001>

<bundles_post_ra>
// kernel: _lambda_.5
= control target key start
LH: loop header
LB: loop body
LE: loop exit
PB: predicated region body
PF: predicated region fallthrough
CT: control target
= control target key end

     0   :  { %vm35_vm0 = vcmask 261120   ;;  %vm18_vm1 = vcmask 523264   ;;  %v208_v3 = vmov 0.0   ;;  %s284_s1 = inlined_call_operand.vmem [shape: f32[32,64], index: 1, kind: input, shape index: {}]   ;;  %s285_s0 = inlined_call_operand.vmem [shape: f32[32,32], index: 0, kind: input, shape index: {}]   ;;  %s286_s2 = inlined_call_operand.vmem [shape: f32[1,64], index: 2, kind: input, shape index: {}]   ;;  %s287_s3 = inlined_call_operand.vmem [shape: f32[32,64], index: 3, kind: output, shape index: {}]  }
   0x1   :  { %v31_v0 = vld [vmem:[%s284_s1] sm:$0xff]  ;;  %v32_v1 = vld [vmem:[%s284_s1 + $0x8] sm:$0xff]  ;;  %v33_v2 = vld [vmem:[%s284_s1 + $0x10] sm:$0xff]  ;;  %20 = vst.msk [vmem:[#allocation2 + $0x8] sm:$0xff] %vm18_vm1, %v208_v3 }
   0x2   :  { %19 = vst.msk [vmem:[#allocation2] sm:$0xff] %vm18_vm1, %v208_v3  ;;  %21 = vst.msk [vmem:[#allocation2 + $0x10] sm:$0xff] %vm18_vm1, %v208_v3  ;;  %v195_v4 = vpack.c.bf16 %v32_v1, %v31_v0  ;;  %v34_v5 = vld [vmem:[%s284_s1 + $0x18] sm:$0xff]  ;;  %v27_v6 = vld [vmem:[%s285_s0] sm:$0xff] }
   0x3   :  { %22 = vst.msk [vmem:[#allocation2 + $0x18] sm:$0xff] %vm18_vm1, %v208_v3  ;;  %v29_v7 = vld [vmem:[%s285_s0 + $0x10] sm:$0xff]  ;;  %v199_v8 = vpack.c.bf16 %v34_v5, %v33_v2  ;;  %189 = vmatprep.mubr.msk.f32.mxu0 %vm35_vm0, %v27_v6  ;;  %v28_v9 = vld [vmem:[%s285_s0 + $0x8] sm:$0xff]  ;;  %v30_v10 = vld [vmem:[%s285_s0 + $0x18] sm:$0xff] }
   0x4   :  { %192 = vmatprep.mubr.msk.f32.mxu1 %vm35_vm0, %v29_v7  ;;  %196 = vmatprep.subr.bf16.mxu0 %v195_v4  ;;  %v172_v23 = vld [vmem:[%s286_s2] ss:$0 sm:$0xff] }
   0x5   :  { %203 = vmatprep.subr.bf16.mxu1 %v195_v4  ;;  %198 = vmatpush3.bf16.msra.mxu0 %v195_v4 }
   0x6   :  { %205 = vmatpush3.bf16.msra.mxu1 %v195_v4  ;;  %200 = vmatprep.subr.bf16.mxu0 %v199_v8 }
   0x7   :  { %204 = vmatprep.subr.bf16.mxu1 %v199_v8 }
   0x8   :  { %v24_v11 = vld [vmem:[#allocation2 + $0x8] sm:$0xff] }
   0x9   :  { %202 = vmatpush3.bf16.msra.mxu0 %v199_v8  ;;  %v23_v13 = vld [vmem:[#allocation2] sm:$0xff]  ;;  %v25_v14 = vld [vmem:[#allocation2 + $0x10] sm:$0xff] }
   0xa   :  { %206 = vmatpush3.bf16.msra.mxu1 %v199_v8  ;;  %v26_v12 = vld [vmem:[#allocation2 + $0x18] sm:$0xff] }
   0xc   :  { %190 = vmatmul.mubr.msk.f32.vlgmr.msra.gmra.mrb[0].mxu0 %vm35_vm0, %v28_v9 }
   0xd   :  { %193 = vmatmul.mubr.msk.f32.vlgmr.msra.gmra.mrb[0].mxu1 %vm35_vm0, %v30_v10 }
  0xdf   :  { %v191_v15 = vpop.f32.mrb[0].mxu0 }
  0xe0   :  { %v194_v16 = vpop.f32.mrb[0].mxu1  ;;  %v134_v17 = vadd.f32 %v191_v15, %v24_v11  ;;  %v114_v19 = vpop.f32.mrb[1].mxu0 }
  0xe1   :  { %v136_v18 = vadd.f32 %v194_v16, %v26_v12  ;;  %v124_v20 = vpop.f32.mrb[1].mxu1  ;;  %v133_v21 = vadd.f32 %v114_v19, %v23_v13 }
  0xe2   :  { %v135_v22 = vadd.f32 %v124_v20, %v25_v14  ;;  %139 = vst.msk [vmem:[#allocation2 + $0x8] sm:$0xff] %vm18_vm1, %v134_v17 }
  0xe3   :  { %141 = vst.msk [vmem:[#allocation2 + $0x18] sm:$0xff] %vm18_vm1, %v136_v18  ;;  %138 = vst.msk [vmem:[#allocation2] sm:$0xff] %vm18_vm1, %v133_v21 }
  0xe4   :  { %140 = vst.msk [vmem:[#allocation2 + $0x10] sm:$0xff] %vm18_vm1, %v135_v22 }
  0xe9   :  { %v146_v24 = vld [vmem:[#allocation2 + $0x8] sm:$0xff] }
  0xea   :  { %v148_v25 = vld [vmem:[#allocation2 + $0x18] sm:$0xff]  ;;  %v157_v26 = vadd.f32 %v172_v23, %v146_v24  ;;  %v145_v28 = vld [vmem:[#allocation2] sm:$0xff] }
  0xeb   :  { %v159_v27 = vadd.f32 %v172_v23, %v148_v25  ;;  %v147_v29 = vld [vmem:[#allocation2 + $0x10] sm:$0xff]  ;;  %v156_v30 = vadd.f32 %v172_v23, %v145_v28 }
  0xec   :  { %v158_v31 = vadd.f32 %v172_v23, %v147_v29  ;;  %161 = vst.msk [vmem:[%s287_s3 + $0x8] sm:$0xff] %vm18_vm1, %v157_v26 }
  0xed   :  { %163 = vst.msk [vmem:[%s287_s3 + $0x18] sm:$0xff] %vm18_vm1, %v159_v27  ;;  %160 = vst.msk [vmem:[%s287_s3] sm:$0xff] %vm18_vm1, %v156_v30 }
  0xee   :  { %162 = vst.msk [vmem:[%s287_s3 + $0x10] sm:$0xff] %vm18_vm1, %v158_v31 }

// kernel: _lambda_.4
= control target key start
LH: loop header
LB: loop body
LE: loop exit
PB: predicated region body
PF: predicated region fallthrough
CT: control target
= control target key end

     0   :  { %vm18_vm0 = vcmask 261120   ;;  %v207_v3 = vmov 0.0   ;;  %s283_s1 = inlined_call_operand.vmem [shape: f32[32,32], index: 1, kind: input, shape index: {}]   ;;  %s284_s0 = inlined_call_operand.vmem [shape: f32[32,32], index: 0, kind: input, shape index: {}]   ;;  %s285_s2 = inlined_call_operand.vmem [shape: f32[1,32], index: 2, kind: input, shape index: {}]   ;;  %s286_s3 = inlined_call_operand.vmem [shape: f32[32,32], index: 3, kind: output, shape index: {}]  }
   0x1   :  { %v31_v0 = vld [vmem:[%s283_s1] sm:$0xff]  ;;  %v32_v1 = vld [vmem:[%s283_s1 + $0x8] sm:$0xff]  ;;  %v33_v2 = vld [vmem:[%s283_s1 + $0x10] sm:$0xff]  ;;  %20 = vst.msk [vmem:[#allocation2 + $0x8] sm:$0xff] %vm18_vm0, %v207_v3 }
   0x2   :  { %19 = vst.msk [vmem:[#allocation2] sm:$0xff] %vm18_vm0, %v207_v3  ;;  %21 = vst.msk [vmem:[#allocation2 + $0x10] sm:$0xff] %vm18_vm0, %v207_v3  ;;  %v194_v4 = vpack.c.bf16 %v32_v1, %v31_v0  ;;  %v34_v5 = vld [vmem:[%s283_s1 + $0x18] sm:$0xff]  ;;  %v27_v6 = vld [vmem:[%s284_s0] sm:$0xff] }
   0x3   :  { %22 = vst.msk [vmem:[#allocation2 + $0x18] sm:$0xff] %vm18_vm0, %v207_v3  ;;  %v29_v7 = vld [vmem:[%s284_s0 + $0x10] sm:$0xff]  ;;  %v198_v8 = vpack.c.bf16 %v34_v5, %v33_v2  ;;  %188 = vmatprep.mubr.msk.f32.mxu0 %vm18_vm0, %v27_v6  ;;  %v28_v9 = vld [vmem:[%s284_s0 + $0x8] sm:$0xff]  ;;  %v30_v10 = vld [vmem:[%s284_s0 + $0x18] sm:$0xff] }
   0x4   :  { %191 = vmatprep.mubr.msk.f32.mxu1 %vm18_vm0, %v29_v7  ;;  %195 = vmatprep.subr.bf16.mxu0 %v194_v4  ;;  %v171_v23 = vld [vmem:[%s285_s2] ss:$0 sm:$0xff] }
   0x5   :  { %202 = vmatprep.subr.bf16.mxu1 %v194_v4  ;;  %197 = vmatpush3.bf16.msra.mxu0 %v194_v4 }
   0x6   :  { %204 = vmatpush3.bf16.msra.mxu1 %v194_v4  ;;  %199 = vmatprep.subr.bf16.mxu0 %v198_v8 }
   0x7   :  { %203 = vmatprep.subr.bf16.mxu1 %v198_v8 }
   0x8   :  { %v24_v11 = vld [vmem:[#allocation2 + $0x8] sm:$0xff] }
   0x9   :  { %201 = vmatpush3.bf16.msra.mxu0 %v198_v8  ;;  %v23_v13 = vld [vmem:[#allocation2] sm:$0xff]  ;;  %v25_v14 = vld [vmem:[#allocation2 + $0x10] sm:$0xff] }
   0xa   :  { %205 = vmatpush3.bf16.msra.mxu1 %v198_v8  ;;  %v26_v12 = vld [vmem:[#allocation2 + $0x18] sm:$0xff] }
   0xc   :  { %189 = vmatmul.mubr.msk.f32.vlgmr.msra.gmra.mrb[0].mxu0 %vm18_vm0, %v28_v9 }
   0xd   :  { %192 = vmatmul.mubr.msk.f32.vlgmr.msra.gmra.mrb[0].mxu1 %vm18_vm0, %v30_v10 }
  0xdf   :  { %v190_v15 = vpop.f32.mrb[0].mxu0 }
  0xe0   :  { %v193_v16 = vpop.f32.mrb[0].mxu1  ;;  %v134_v17 = vadd.f32 %v190_v15, %v24_v11  ;;  %v114_v19 = vpop.f32.mrb[1].mxu0 }
  0xe1   :  { %v136_v18 = vadd.f32 %v193_v16, %v26_v12  ;;  %v124_v20 = vpop.f32.mrb[1].mxu1  ;;  %v133_v21 = vadd.f32 %v114_v19, %v23_v13 }
  0xe2   :  { %v135_v22 = vadd.f32 %v124_v20, %v25_v14  ;;  %138 = vst.msk [vmem:[#allocation2 + $0x8] sm:$0xff] %vm18_vm0, %v134_v17 }
  0xe3   :  { %140 = vst.msk [vmem:[#allocation2 + $0x18] sm:$0xff] %vm18_vm0, %v136_v18  ;;  %137 = vst.msk [vmem:[#allocation2] sm:$0xff] %vm18_vm0, %v133_v21 }
  0xe4   :  { %139 = vst.msk [vmem:[#allocation2 + $0x10] sm:$0xff] %vm18_vm0, %v135_v22 }
  0xe9   :  { %v145_v24 = vld [vmem:[#allocation2 + $0x8] sm:$0xff] }
  0xea   :  { %v147_v25 = vld [vmem:[#allocation2 + $0x18] sm:$0xff]  ;;  %v156_v26 = vadd.f32 %v171_v23, %v145_v24  ;;  %v144_v28 = vld [vmem:[#allocation2] sm:$0xff] }
  0xeb   :  { %v158_v27 = vadd.f32 %v171_v23, %v147_v25  ;;  %v146_v29 = vld [vmem:[#allocation2 + $0x10] sm:$0xff]  ;;  %v155_v30 = vadd.f32 %v171_v23, %v144_v28 }
  0xec   :  { %v157_v31 = vadd.f32 %v171_v23, %v146_v29  ;;  %160 = vst.msk [vmem:[%s286_s3 + $0x8] sm:$0xff] %vm18_vm0, %v156_v26 }
  0xed   :  { %162 = vst.msk [vmem:[%s286_s3 + $0x18] sm:$0xff] %vm18_vm0, %v158_v27  ;;  %159 = vst.msk [vmem:[%s286_s3] sm:$0xff] %vm18_vm0, %v155_v30 }
  0xee   :  { %161 = vst.msk [vmem:[%s286_s3 + $0x10] sm:$0xff] %vm18_vm0, %v157_v31 }

// kernel: _lambda_.6
= control target key start
LH: loop header
LB: loop body
LE: loop exit
PB: predicated region body
PF: predicated region fallthrough
CT: control target
= control target key end

     0   :  { %s1876_s0 = inlined_call_operand.vmem [shape: f32[2,4,16,8], index: 0, kind: input, shape index: {}]   ;;  %s1877_s1 = inlined_call_operand.vmem [shape: f32[2,2,4,16,8], index: 1, kind: input, shape index: {}, may-alias: {1,2}]   ;;  %s1878_s2 = inlined_call_operand.vmem [shape: f32[2,2,4,16,8], index: 2, kind: input, shape index: {}, may-alias: {1,2}]   ;;  %s1879_s3 = inlined_call_operand.vmem [shape: f32[2,16,32], index: 3, kind: output, shape index: {0}]   ;;  %s1880_s4 = inlined_call_operand.hbm [shape: f32[2,16,16], index: 4, kind: output, shape index: {1}]  }
   0x1   :  { %1881 = sst [smem:[#allocation6_spill]] %s1876_s0 }
   0x2   :  { %1882 = sst [smem:[#allocation7_spill]] %s1877_s1 }
   0x3   :  { %10 = vsyncpa [#allocation4], 0 }
   0x4   :  { %12 = vsyncpa [#allocation4 + $0x1], 0  ;;  %s1612_s15 = smov 0   ;;  %s1614_s16 = smov 0  }
   0x5   :  { %s1616_s17 = smov 0   ;;  %s1618_s18 = smov 0  }
   0x6   :  { %s1620_s19 = smov 0   ;;  %s1622_s20 = smov 0  }
   0x7   :  { %s1624_s21 = smov 0   ;;  %s1626_s22 = smov 0  }
   0x8 LB: > { %s1227_s23 = sadd.s32 4294967295, %s1578_s22   ;;  %s1228_s24 = sadd.s32 4294967294, %s1578_s22   ;;  %s1578_s22 = sphi %s1626_s22, %s18_s22   ;;  %s1574_s21 = sphi %s1624_s21, %s1896_s21   ;;  %s1570_s20 = sphi %s1622_s20, %s1895_s20   ;;  %s1566_s19 = sphi %s1620_s19, %s1894_s19   ;;  %s1562_s18 = sphi %s1618_s18, %s1893_s18   ;;  %s1558_s17 = sphi %s1616_s17, %s1892_s17   ;;  %s1554_s16 = sphi %s1614_s16, %s1891_s16   ;;  %s1550_s15 = sphi %s1612_s15, %s1890_s15  }
   0x9   : > { %s27_s25 = sadd.s32 1, %s1570_s20  ;;  %s30_s26 = sadd.s32 1, %s1574_s21 }
   0xa   : > { %p28_p0 = scmp.ge.s32.totalorder %s27_s25, 2  ;;  %p46_p1 = scmp.ne.s32.totalorder %s1558_s17, %s1554_s16 }
   0xb   : > { %p47_p2 = scmp.eq.s32.totalorder %s1578_s22, 0  ;;  %p158_p5 = scmp.eq.s32.totalorder %s1227_s23, 3 }
   0xc   : > { %s1898_s25 = smov (%p28_p0, %s27_s25), 0  ;;  %s1900_s26 = smov (!%p28_p0, %s30_s26), %s1574_s21 }
   0xd   : > { %s35_s27 = ssub.s32 %s1570_s20, %s1898_s25  ;;  %p1664_p3 = por %p47_p2, %p46_p1 }
   0xe   : > { %p32_p4 = scmp.ge.s32.totalorder %s1900_s26, 2  ;;  %p163_p6 = scmp.ne.s32.totalorder %s1554_s16, %s1550_s15 }
   0xf   : > { %p164_p7 = scmp.eq.s32.totalorder %s1228_s24, 3  ;;  %p1672_p8 = por %p158_p5, %p46_p1 }
  0x10   : > { %s1902_s26 = smov (%p32_p4, %s1900_s26), 0  ;;  %s39_s7 = sadd.s32 1, %s1558_s17 }
  0x11   : > { %p1676_p9 = por %p164_p7, %p163_p6  ;;  %s34_s5 = ssub.s32 %s1574_s21, %s1902_s26 }
  0x12   : > { %s36_s6 = sor.u32 %s35_s27, %s34_s5  ;;  %p1230_p11 = scmp.ge.s32.totalorder %s1578_s22, 4 }
  0x13   : > { %p37_p10 = scmp.eq.s32.totalorder %s36_s6, 0 }
  0x14   : > { %180 = sbr.rel (%p1230_p11) target bundleno = 39 (0x27), region = 16 }
  0x15   : > { %s1684_s8 = scalar_select %p37_p10, %s1558_s17, %s39_s7  }
  0x1b   : > { %183 = sbr.rel (!%p1664_p3) target bundleno = 39 (0x27), region = 20  ;;  %s185_s9 = sand.u32 (%p1664_p3), 1, %s1558_s17  }
  0x1c   : > { %s1232_s10 = sshll.u32 (%p1664_p3), %s1574_s21, 3  ;;  %s1231_s11 = sshll.u32 (%p1664_p3), %s185_s9, 5 }
  0x1d   : > { %s189_s12 = sadd.s32 (%p1664_p3), %s1570_s20, %s1232_s10  ;;  %s1886_s0 = sld [smem:[#allocation6_spill]] (%p1664_p3) }
  0x1e   : > { %s1233_s13 = sshll.u32 (%p1664_p3), %s189_s12, 3  ;;  %s187_s27 = scalar_lea.vmem (%p1664_p3), [#allocation2], %s1231_s11 }
  0x23   : > { %s191_s24 = scalar_lea.vmem %s1886_s0, %s1233_s13 }
  0x24   : > { %v225_v0 = vld [vmem:[%s191_s24] sm:$0xff]  ;;  %v227_v1 = vld [vmem:[%s191_s24 + $0x10] sm:$0xff] }
  0x25   : > { %v229_v2 = vld [vmem:[%s191_s24 + $0x20] sm:$0xff]  ;;  %226 = vst [vmem:[%s187_s27] sm:$0xff] %v225_v0  ;;  %228 = vst [vmem:[%s187_s27 + $0x8] sm:$0xff] %v227_v1  ;;  %v231_v3 = vld [vmem:[%s191_s24 + $0x30] sm:$0xff] }
  0x26   : > { %230 = vst [vmem:[%s187_s27 + $0x10] sm:$0xff] %v229_v2  ;;  %232 = vst [vmem:[%s187_s27 + $0x18] sm:$0xff] %v231_v3 }
  0x27 PF: > { %p1234_p12 = scmp.ge.s32.totalorder %s1578_s22, 1  ;;  %p254_p13 = scmp.lt.s32.totalorder %s1578_s22, 5 }
  0x29   : > { %p255_p0 = pnand %p1234_p12, %p254_p13 }
  0x2a   : > { %p305_p1 = scmp.lt.s32.totalorder (!%p255_p0), %s1566_s19, 1  ;;  %v1580_v4 = vmov (!%p255_p0), 0.0|0.0   ;;  %vm1581_vm0 = vmmov (!%p255_p0), 0   ;;  %v1582_v5 = vmov (!%p255_p0), 0.0   ;;  %vm329_vm1 = vcmask (!%p255_p0), 64512   ;;  %s1709_s6 = sand.u32 (!%p255_p0), 1, %s1554_s16  }
  0x2b   : > { %258 = sbr.rel (%p255_p0) target bundleno = 2544 (0x9f0), region = 66  ;;  %1363 = vmatprep.subr.bf16.mxu0 (!%p255_p0), %v1580_v4  ;;  %1311 = vmatprep.mubr.msk.f32.mxu0 (!%p255_p0), %vm1581_vm0, %v1582_v5  ;;  %s1887_s1 = sld [smem:[#allocation7_spill]] (!%p255_p0)  ;;  %vm1720_vm2 = vmpackc.low (!%p255_p0), %vm329_vm1, %vm329_vm1  ;;  %vm409_vm3 = vcmask (!%p255_p0), 130048   ;;  %vm677_vm4 = vcmask (!%p255_p0), 130112   ;;  %vm860_vm5 = vcmask (!%p255_p0), 195712  }
  0x2c   : > { %1367 = vmatprep.subr.bf16.mxu1 (!%p255_p0), %v1580_v4  ;;  %1318 = vmatprep.mubr.msk.f32.mxu1 (!%p255_p0), %vm1581_vm0, %v1582_v5  ;;  %s1235_s11 = sshll.u32 (!%p255_p0), %s1709_s6, 5  ;;  %s1236_s24 = sshll.u32 (!%p255_p0), %s1709_s6, 3 }
  0x2d   : > { %s1728_s12 = scalar_lea.vmem (!%p255_p0), [#allocation2], %s1235_s11  ;;  %s1747_s27 = scalar_lea.vmem (!%p255_p0), [#allocation3], %s1236_s24 }
  0x2e   : > { %v324_v10 = vld [vmem:[%s1728_s12] sm:$0xff] (!%p255_p0)  ;;  %v1249_v31 = vld [vmem:[%s1728_s12 + $0x8] sm:$0xff] (!%p255_p0)  ;;  %p318_p2 = scmp.lt.s32.totalorder (!%p255_p0), %s1562_s18, 1  ;;  %v1258_v56 = vld [vmem:[%s1728_s12 + $0x10] sm:$0xff] (!%p255_p0)  ;;  %s1060_s14 = scalar_lea.sflag (!%p255_p0), [#allocation4], %s1709_s6 }
  0x32   : > { %s1702_s28 = scalar_select %p305_p1, %s1566_s19, 1 }
  0x34   : > { %s1281_s5 = sshll.u32 %s1702_s28, 6  ;;  %s1241_s7 = sshll.u32 %s1702_s28, 1 }
  0x35   : > { %s1714_s10 = scalar_lea.vmem %s1887_s1, %s1281_s5  ;;  %s1739_s23 = scalar_lea.vmem %s1878_s2, %s1281_s5 }
  0x36   : > { %v325_v6 = vld [vmem:[%s1714_s10] sm:$0xff]  ;;  %v326_v7 = vld [vmem:[%s1714_s10 + $0x8] sm:$0xff]  ;;  %v1250_v26 = vld [vmem:[%s1714_s10 + $0x10] sm:$0xff]  ;;  %s319_s5 = scalar_select %p318_p2, %s1562_s18, 1 }
  0x37   : > { %v1364_v9 = vpack.c.bf16 %v326_v7, %v325_v6  ;;  %v1243_v19 = vld [vmem:[%s1739_s23 + $0x80] sm:$0xff]  ;;  %v1244_v20 = vld [vmem:[%s1739_s23 + $0x88] sm:$0xff]  ;;  %v1251_v27 = vld [vmem:[%s1714_s10 + $0x18] sm:$0xff]  ;;  %s1583_s28 = smov 8  }
  0x38   : > { %v1368_v21 = vpack.c.bf16 %v1244_v20, %v1243_v19  ;;  %v1371_v29 = vpack.c.bf16 %v1251_v27, %v1250_v26  ;;  %s321_s9 = sadd.s32 %s1241_s7, %s319_s5  ;;  %v1252_v42 = vld [vmem:[%s1739_s23 + $0x90] sm:$0xff]  ;;  %v1253_v43 = vld [vmem:[%s1739_s23 + $0x98] sm:$0xff]  ;;  %v1259_v49 = vld [vmem:[%s1714_s10 + $0x20] sm:$0xff]  ;;  %s1078_s7 = sshll.u32 %s1747_s27, 4  ;;  %s1079_s7 = int_to_ptr.vmem [resolvable:$true] %s1078_s7 }
  0x39   : > { %1366 = vmatpush3.bf16.xpose.msk.msra.mxu0 %vm1720_vm2, %v1364_v9  ;;  %s1242_s11 = sshll.u32 %s321_s9, 3  ;;  %v1375_v44 = vpack.c.bf16 %v1253_v43, %v1252_v42  ;;  %v1260_v50 = vld [vmem:[%s1714_s10 + $0x28] sm:$0xff]  ;;  %v1261_v3 = vld [vmem:[%s1739_s23 + $0xa0] sm:$0xff] }
  0x3a   : > { %1374 = vmatprep.subr.bf16.mxu0 %v1580_v4  ;;  %1369 = vmatpush3.bf16.msra.mxu1 %v1368_v21  ;;  %s1767_s24 = scalar_lea.vmem %s1879_s3, %s1242_s11  ;;  %v1378_v52 = vpack.c.bf16 %v1260_v50, %v1259_v49  ;;  %v1262_v6 = vld [vmem:[%s1739_s23 + $0xa8] sm:$0xff] }
  0x3b   : > { %1370 = vmatprep.subr.bf16.mxu1 %v1580_v4  ;;  %v1382_v7 = vpack.c.bf16 %v1262_v6, %v1261_v3 }
  0x40   : > { %1312 = vmatmul.mubr.msk.f32.vlgmr.msra.gmra.mrb[0].mxu0 %vm329_vm1, %v324_v10 }
  0x41   : > { %1332 = vmatprep.mubr.msk.f32.mxu0 %vm1581_vm0, %v1582_v5  ;;  %1376 = vmatpush3.bf16.msra.mxu0 %v1375_v44 }
  0x42   : > { %1377 = vmatprep.subr.bf16.mxu0 %v1580_v4 }
 0x113   : > { %v405_v11 = vpop.f32.mrb[0].mxu0 }
 0x114   : > { %v1313_v12 = vpop.f32.mrb[1].mxu0  ;;  %v410_v13 = vsel %vm409_vm3, %v405_v11, -inf }
 0x115   : > { %411 = vmax.xlane.f32.xlu0 %v410_v13  ;;  %v1268_v13 = vld [vmem:[%s1714_s10 + $0x30] sm:$0xff] }
 0x1a2   : > { %v412_v14 = vpop.xlane.xlu0 %411 }
 0x1a3   : > { %v413_v15 = vsub.f32 %v405_v11, %v412_v14  ;;  %v1269_v14 = vld [vmem:[%s1714_s10 + $0x38] sm:$0xff]  ;;  %s1584_s10 = smov 16  }
 0x1a5   : > { %v414_v16 = vmul.f32 1.442695, %v413_v15 }
 0x1a7   : > { %1468 = vpow2.f32 %v414_v16  ;;  %v1385_v16 = vpack.c.bf16 %v1269_v14, %v1268_v13 }
 0x1b1   : > { %v1469_v17 = vpop.eup %1468 }
 0x1b2   : > { %v416_v18 = vsel %vm409_vm3, %v1469_v17, 0.0 }
 0x1b3   : > { %417 = vadd.xlane.f32.xlu0 %v416_v18 }
 0x240   : > { %v418_v22 = vpop.xlane.xlu0 %417 }
 0x241   : > { %1470 = vrcp.f32 %v418_v22 }
 0x24b   : > { %v1471_v23 = vpop.eup %1470 }
 0x24c   : > { %v420_v24 = vmul.f32 %v1471_v23, %v418_v22 }
 0x24e   : > { %v421_v25 = vsub.f32 2.0, %v420_v24 }
 0x250   : > { %v422_v28 = vmul.f32 %v1471_v23, %v421_v25 }
 0x252   : > { %v423_v30 = vmul.f32 %v1469_v17, %v422_v28 }
 0x254   : > { %498 = vst.msk [vmem:[%s1747_s27] sm:$0xff] %vm409_vm3, %v423_v30  ;;  %1319 = vmatmul.mubr.msk.f32.vlgmr.msra.gmra.mrb[0].mxu1 %vm409_vm3, %v423_v30  ;;  %v1271_v30 = vld [vmem:[%s1739_s23 + $0xb8] sm:$0xff] }
 0x255   : > { %1373 = vmatpush3.bf16.xpose.msk.msra.mxu1 %vm1720_vm2, %v1371_v29  ;;  %1325 = vmatprep.mubr.msk.f32.mxu1 %vm1581_vm0, %v1582_v5  ;;  %v1270_v29 = vld [vmem:[%s1739_s23 + $0xb0] sm:$0xff] }
 0x256   : > { %1381 = vmatprep.subr.bf16.mxu1 %v1580_v4 }
 0x25b   : > { %v679_v54 = vld [vmem:[%s1747_s27] sm:$0xff] }
 0x25c   : > { %1326 = vmatmul.mubr.msk.f32.vlgmr.msra.gmra.mrb[2].mxu1 %vm329_vm1, %v1249_v31  ;;  %v1389_v31 = vpack.c.bf16 %v1271_v30, %v1270_v29 }
 0x25d   : > { %1346 = vmatprep.mubr.msk.f32.mxu1 %vm1581_vm0, %v1582_v5  ;;  %1383 = vmatpush3.bf16.msra.mxu1 %v1382_v7 }
 0x25e   : > { %1384 = vmatprep.subr.bf16.mxu1 %v1580_v4 }
 0x327   : > { %v493_v32 = vpop.f32.mrb[0].mxu1 }
 0x328   : > { %497 = vst.msk [vmem:[%s1767_s24] sm:$0xff] %vm329_vm1, %v493_v32  ;;  %v1320_v33 = vpop.f32.mrb[1].mxu1 }
 0x32f   : > { %v582_v34 = vpop.f32.mrb[2].mxu1 }
 0x330   : > { %v1327_v35 = vpop.f32.mrb[3].mxu1  ;;  %v586_v36 = vsel %vm409_vm3, %v582_v34, -inf }
 0x331   : > { %587 = vmax.xlane.f32.xlu1 %v586_v36 }
 0x3be   : > { %v588_v37 = vpop.xlane.xlu1 %587 }
 0x3bf   : > { %v589_v38 = vsub.f32 %v582_v34, %v588_v37 }
 0x3c1   : > { %v590_v39 = vmul.f32 1.442695, %v589_v38 }
 0x3c3   : > { %1472 = vpow2.f32 %v590_v39 }
 0x3cd   : > { %v1473_v40 = vpop.eup %1472 }
 0x3ce   : > { %v592_v41 = vsel %vm409_vm3, %v1473_v40, 0.0 }
 0x3cf   : > { %593 = vadd.xlane.f32.xlu1 %v592_v41 }
 0x45c   : > { %v594_v45 = vpop.xlane.xlu1 %593 }
 0x45d   : > { %1474 = vrcp.f32 %v594_v45 }
 0x467   : > { %v1475_v46 = vpop.eup %1474 }
 0x468   : > { %v596_v47 = vmul.f32 %v1475_v46, %v594_v45 }
 0x46a   : > { %v597_v48 = vsub.f32 2.0, %v596_v47 }
 0x46c   : > { %v598_v51 = vmul.f32 %v1475_v46, %v597_v48 }
 0x46e   : > { %v599_v53 = vmul.f32 %v1473_v40, %v598_v51 }
 0x470   : > { %v680_v55 = vadd.f32 %v679_v54, %v599_v53  ;;  %1333 = vmatmul.mubr.msk.f32.vlgmr.msra.gmra.mrb[2].mxu0 %vm409_vm3, %v599_v53 }
 0x471   : > { %1380 = vmatpush3.bf16.xpose.msk.msra.mxu0 %vm1720_vm2, %v1378_v52  ;;  %1339 = vmatprep.mubr.msk.f32.mxu0 %vm1581_vm0, %v1582_v5 }
 0x472   : > { %681 = vst.msk [vmem:[%s1747_s27] sm:$0xff] %vm409_vm3, %v680_v55  ;;  %1388 = vmatprep.subr.bf16.mxu0 %v1580_v4  ;;  %v1267_v4 = vld [vmem:[%s1728_s12 + $0x18] sm:$0xff]  ;;  %s1277_s12 = sshll.u32 %s1566_s19, 1 }
 0x473   : > { %s1074_s23 = sadd.s32 %s1562_s18, %s1277_s12 }
 0x474   : > { %s1278_s5 = sshll.u32 %s1074_s23, 7 }
 0x475   : > { %s1827_s13 = scalar_lea.hbm %s1880_s4, %s1278_s5 }
 0x478   : > { %1340 = vmatmul.mubr.msk.f32.vlgmr.msra.gmra.mrb[4].mxu0 %vm329_vm1, %v1258_v56 }
 0x479   : > { %1360 = vmatprep.mubr.msk.f32.mxu0 %vm1581_vm0, %v1582_v5  ;;  %v862_v18 = vld [vmem:[%s1747_s27] sm:$0xff]  ;;  %1390 = vmatpush3.bf16.msra.mxu0 %v1389_v31 }
 0x543   : > { %v669_v57 = vpop.f32.mrb[2].mxu0 }
 0x544   : > { %v1334_v58 = vpop.f32.mrb[3].mxu0 }
 0x54b   : > { %v765_v59 = vpop.f32.mrb[4].mxu0 }
 0x54c   : > { %v1341_v60 = vpop.f32.mrb[5].mxu0  ;;  %v769_v61 = vsel %vm409_vm3, %v765_v59, -inf }
 0x54d   : > { %770 = vmax.xlane.f32.xlu0 %v769_v61 }
 0x5da   : > { %v771_v62 = vpop.xlane.xlu0 %770 }
 0x5db   : > { %v772_v63 = vsub.f32 %v765_v59, %v771_v62 }
 0x5dd   : > { %v773_v0 = vmul.f32 1.442695, %v772_v63 }
 0x5df   : > { %1476 = vpow2.f32 %v773_v0 }
 0x5e9   : > { %v1477_v1 = vpop.eup %1476 }
 0x5ea   : > { %v775_v2 = vsel %vm409_vm3, %v1477_v1, 0.0 }
 0x5eb   : > { %776 = vadd.xlane.f32.xlu1 %v775_v2 }
 0x678   : > { %v777_v9 = vpop.xlane.xlu1 %776 }
 0x679   : > { %1478 = vrcp.f32 %v777_v9 }
 0x683   : > { %v1479_v10 = vpop.eup %1478 }
 0x684   : > { %v779_v11 = vmul.f32 %v1479_v10, %v777_v9 }
 0x686   : > { %v780_v12 = vsub.f32 2.0, %v779_v11 }
 0x688   : > { %v781_v15 = vmul.f32 %v1479_v10, %v780_v12 }
 0x68a   : > { %v782_v17 = vmul.f32 %v1477_v1, %v781_v15 }
 0x68c   : > { %v863_v19 = vadd.f32 %v862_v18, %v782_v17  ;;  %1347 = vmatmul.mubr.msk.f32.vlgmr.msra.gmra.mrb[4].mxu1 %vm409_vm3, %v782_v17 }
 0x68d   : > { %1387 = vmatpush3.bf16.xpose.msk.msra.mxu1 %vm1720_vm2, %v1385_v16  ;;  %1353 = vmatprep.mubr.msk.f32.mxu1 %vm1581_vm0, %v1582_v5 }
 0x68e   : > { %864 = vst.msk [vmem:[%s1747_s27] sm:$0xff] %vm409_vm3, %v863_v19 }
 0x694   : > { %1354 = vmatmul.mubr.msk.f32.vlgmr.msra.gmra.mrb[6].mxu1 %vm329_vm1, %v1267_v4 }
 0x695   : > { %v1045_v39 = vld [vmem:[%s1747_s27] sm:$0xff] }
 0x75f   : > { %v852_v20 = vpop.f32.mrb[4].mxu1 }
 0x760   : > { %v1348_v21 = vpop.f32.mrb[5].mxu1 }
 0x767   : > { %v948_v22 = vpop.f32.mrb[6].mxu1 }
 0x768   : > { %v1355_v23 = vpop.f32.mrb[7].mxu1  ;;  %v952_v24 = vsel %vm409_vm3, %v948_v22, -inf }
 0x769   : > { %953 = vmax.xlane.f32.xlu0 %v952_v24 }
 0x77f   : > { %674 = vrot.lane.b32.xlu0 %v669_v57, %s1583_s28  ;;  %s1484_s28 = scalar_lea.vmem %s1079_s7, 128 }
 0x780   : > { %p1485_p3 = scmp.ne.s32.totalorder %s1079_s7, %s1484_s28 }
 0x782   : > { %p1486_p4 = pnand %p1485_p3, %p1672_p8 }
 0x784   : > { %p1487_p5 = pneg %p1486_p4 }
 0x7f6   : > { %v954_v8 = vpop.xlane.xlu0 %953 }
 0x7f7   : > { %v955_v25 = vsub.f32 %v948_v22, %v954_v8 }
 0x7f9   : > { %v956_v5 = vmul.f32 1.442695, %v955_v25 }
 0x7fa   : > { %v675_v26 = vpop.permute.xlu0 %674 }
 0x7fb   : > { %1480 = vpow2.f32 %v956_v5  ;;  %678 = vst.msk [vmem:[%s1767_s24] sm:$0xff] %vm677_vm4, %v675_v26 }
 0x805   : > { %v1481_v27 = vpop.eup %1480 }
 0x806   : > { %v958_v28 = vsel %vm409_vm3, %v1481_v27, 0.0 }
 0x807   : > { %959 = vadd.xlane.f32.xlu1 %v958_v28 }
 0x818   : > { %857 = vrot.lane.b32.xlu1 %v852_v20, %s1584_s10  ;;  %s1585_s10 = smov [#allocation3]  }
 0x819   : > { %s1488_s0 = sshll.u32 %s1585_s10, 4  ;;  %s1489_s0 = int_to_ptr.vmem [resolvable:$false] %s1488_s0 }
 0x81a   : > { %s1490_s1 = scalar_lea.vmem %s1489_s0, 256  ;;  %p1491_p6 = scmp.lt.s32.totalorder %s1079_s7, %s1489_s0 }
 0x81b   : > { %p1492_p7 = scmp.lt.s32.totalorder %s1490_s1, %s1484_s28 }
 0x81d   : > { %p1493_p10 = por %p1492_p7, %p1491_p6 }
 0x81f   : > { %p1494_p11 = pnand %p1493_p10, %p1487_p5 }
 0x894   : > { %v960_v32 = vpop.xlane.xlu1 %959 }
 0x895   : > { %1482 = vrcp.f32 %v960_v32 }
 0x898   : > { %v858_v33 = vpop.permute.xlu1 %857 }
 0x899   : > { %861 = vst.msk [vmem:[%s1767_s24] sm:$0xff] %vm860_vm5, %v858_v33 }
 0x89f   : > { %v1483_v34 = vpop.eup %1482 }
 0x8a0   : > { %v962_v35 = vmul.f32 %v1483_v34, %v960_v32 }
 0x8a2   : > { %v963_v36 = vsub.f32 2.0, %v962_v35 }
 0x8a4   : > { %v964_v37 = vmul.f32 %v1483_v34, %v963_v36 }
 0x8a6   : > { %v965_v38 = vmul.f32 %v1481_v27, %v964_v37 }
 0x8a8   : > { %v1046_v40 = vadd.f32 %v1045_v39, %v965_v38  ;;  %1361 = vmatmul.mubr.msk.f32.vlgmr.msra.gmra.mrb[6].mxu0 %vm409_vm3, %v965_v38 }
 0x8aa   : > { %1047 = vst.msk [vmem:[%s1747_s27] sm:$0xff] %vm409_vm3, %v1046_v40 }
 0x8b1   : > { %v1048_v41 = vld [vmem:[%s1747_s27] sm:$0xff] }
 0x8b2   : > { %v1049_v42 = vmul.f32 0.25, %v1048_v41 }
 0x8b4   : > { %1050 = vst.msk [vmem:[%s1747_s27] sm:$0xff] %vm409_vm3, %v1049_v42 }
 0x8b5   : > { %1497 = shalt.err (!%p1494_p11)
}
 0x8b6   : > { %s1498_s18 = scalar_lea.hbm %s1827_s13, 128  ;;  %s1502_s27 = scalar_lea.hbm %s1880_s4, 512 }
 0x8b7   : > { %p1499_p12 = scmp.ne.s32.totalorder %s1827_s13, %s1498_s18  ;;  %p1503_p1 = scmp.lt.u32.totalorder %s1827_s13, %s1880_s4 }
 0x8b8   : > { %p1504_p2 = scmp.lt.u32.totalorder %s1502_s27, %s1498_s18  ;;  %p1506_p4 = scmp.lt.u32.totalorder %s1498_s18, %s1827_s13 }
 0x8b9   : > { %p1500_p13 = pnand %p1499_p12, %p1672_p8 }
 0x8ba   : > { %p1505_p3 = por %p1504_p2, %p1503_p1 }
 0x8bb   : > { %p1501_p0 = pneg %p1500_p13 }
 0x8bc   : > { %p1507_p5 = por %p1506_p4, %p1505_p3 }
 0x8be   : > { %p1508_p6 = pnand %p1507_p5, %p1501_p0 }
 0x8c0   : > { %1511 = shalt.err (!%p1508_p6)
}
 0x8c1   : > { %1391 = dma.vmem_to_hbm [thread:$0]  (%p1672_p8), %s1079_s7, 128, %s1827_s13, %s1060_s14   ;;  %vm1043_vm6 = vcmask 261312  }
 0x8c2   : > { %s1586_s1 = smov 24  }
 0x97b   : > { %v1035_v43 = vpop.f32.mrb[6].mxu0 }
 0x97c   : > { %1040 = vrot.lane.b32.xlu1 %v1035_v43, %s1586_s1  ;;  %v1362_v44 = vpop.f32.mrb[7].mxu0 }
 0x9ee   : > { %v1041_v45 = vpop.permute.xlu1 %1040 }
 0x9ef   : > { %1044 = vst.msk [vmem:[%s1767_s24] sm:$0xff] %vm1043_vm6, %v1041_v45 }
 0x9f0 PF: > { %p1397_p7 = scmp.ge.s32.totalorder %s1578_s22, 2  ;;  %s1101_s23 = sand.u32 1, %s1550_s15  }
 0x9f1   : > { %s1102_s5 = scalar_lea.sflag [#allocation4], %s1101_s23 }
 0x9f2   : > { %p1394_p10 = pnand %p1397_p7, %p1676_p9 }
 0x9f4   : > { %1545 = dma.done.wait (!%p1394_p10), %s1102_s5, 128  }
 0x9f5   : > { %1547 = vsyncadd (!%p1394_p10), %s1102_s5, 4294967168  ;;  %s18_s22 = sadd.s32 1, %s1578_s22   ;;  %s1890_s15 = smov %s1554_s16 }
 0x9f6   : > { %p15_p8 = scmp.ge.s32.totalorder %s18_s22, 6   ;;  %s1891_s16 = smov %s1558_s17 }
 0x9f7   : > { %s1892_s17 = smov %s1684_s8  ;;  %s1893_s18 = smov %s1570_s20 }
 0x9f8   : > { %s1894_s19 = smov %s1574_s21  ;;  %s1895_s20 = smov %s1898_s25 }
 0x9f9   : > { %s1896_s21 = smov %s1902_s26  ;;  %17 = sbr.rel (!%p15_p8) target bundleno = 8 (0x8), region = 137 }
 0xa00   :  { %1107 = vsyncpa [#allocation4], 1 }
 0xa01   :  { %1109 = vsyncpa [#allocation4 + $0x1], 1 }

</bundles_post_ra>
